<compile_context>
chip_gen: v6e
topology: v6e:2x2x1
jax: 0.10.0
libtpu: 0.0.40
codegen_flags: <defaults>
</compile_context>

<pallas_src>
import functools

import jax
import jax.numpy as jnp
from jax.experimental import pallas as pl
from jax.experimental.pallas import tpu as pltpu

_NEG_BIG = -1e30  # stands in for log(0): exp(e*_NEG_BIG) = 0 for e>0, = 1 for e==0


def _custom_conv_kernel(p_ref, e_ref, wbd_ref, b_ref, o_ref):
    # p_ref:   (TPM, G*R)      packed patch tile (G patches per row, R fast)
    # e_ref:   (1, O*G*R)      exponents: col o*G*R + g*R + r -> exponent[o, r]
    # wbd_ref: (O*G*R, LANES)  block-diag weights: row o*G*R+g*R+r, col g*O+o -> weight[o, r]
    # b_ref:   (1, LANES)      bias row: col g*O+o -> bias[o] (zero past G*O)
    # o_ref:   (TPM, LANES)    col g*O+o -> output channel o of packed patch g
    p = p_ref[...]
    e = e_ref[...]
    n_rep = e.shape[1] // p.shape[1]                   # == O (static)

    # log hoisted out of the per-output-channel work (EUP, once per element).
    lp = jnp.where(p > 0.0, jnp.log(p), _NEG_BIG)      # (TPM, G*R)
    if n_rep > 1:
        lp_all = jnp.concatenate([lp] * n_rep, axis=-1)  # (TPM, O*G*R), [o][g][r]
    else:
        lp_all = lp
    powered = jnp.exp(e * lp_all)                      # p**e for all (o, g) at once

    # R-reduction on the MXU.  Operand dtype is explicit (bf16 by default,
    # single MXU pass); accumulation is always f32.
    acc = jnp.dot(powered.astype(wbd_ref.dtype), wbd_ref[...],
                  preferred_element_type=jnp.float32)   # (TPM, LANES)
    o_ref[...] = (acc + b_ref[...]).astype(o_ref.dtype)


def _im2col(x, K, stride, pad):
    """x: (B, C, H, W) -> patches (B, C, K, K, OH, OW)."""
    B, C, H, W = x.shape
    xp = jnp.pad(x, ((0, 0), (0, 0), (pad, pad), (pad, pad)))
    OH = (H + 2 * pad - K) // stride + 1
    OW = (W + 2 * pad - K) // stride + 1
    rows = []
    for kh in range(K):
        cols = []
        for kw in range(K):
            cols.append(
                xp[:, :, kh: kh + OH * stride: stride, kw: kw + OW * stride: stride]
            )
        rows.append(jnp.stack(cols, axis=2))           # (B, C, K, OH, OW)
    patches = jnp.stack(rows, axis=2)                  # (B, C, K, K, OH, OW)
    return patches, OH, OW


def _plan_tiles(m_pack, G, R, O, lanes, mxu_bytes, target_patches):
    """Packed-row tile size + VMEM limit.

    Tile is a multiple of 8, prefers an exact divisor of the 8-aligned packed
    row count (no pad copy), is capped so the parallel grid has >= 2 steps when
    there is enough work (v7x: 2 TensorCores), and respects a VMEM budget safe
    on v7x's 64 MiB.  vmem_limit_bytes is derived from the real footprint.
    """
    GR, OGR = G * R, O * G * R
    # grid-invariant operands (w_bd double-buffered) + per-row working set
    fixed = 2 * OGR * lanes * mxu_bytes + OGR * 4 + lanes * 4
    per_row = 3 * OGR * 4 + 2 * GR * 4 + 2 * lanes * 4  # log/exp slabs + p + out (dbl-buf)
    budget = 24 * (1 << 20)

    m8 = pl.cdiv(m_pack, 8) * 8
    target_pm = max(8, (max(target_patches // G, 8) // 8) * 8)
    cap = min(target_pm, m8)
    if m8 >= 16:                                       # leave work for both v7x TCs
        cap = min(cap, max(8, ((m8 // 2) // 8) * 8))
    if fixed + 8 * per_row < budget:
        cap = min(cap, max(8, int((budget - fixed) // per_row) // 8 * 8))
    else:
        cap = 8
    cap = max(8, cap)

    tile = cap
    for t in range(cap, 7, -8):                         # prefer exact divisor -> no pad
        if m8 % t == 0:
            tile = t
            break

    vmem_limit = fixed + tile * per_row + 8 * (1 << 20)  # headroom for compiler scratch
    vmem_limit = int(min(max(vmem_limit, 16 * (1 << 20)), 48 * (1 << 20)))
    return tile, vmem_limit


def custom_conv2d(x, weight, bias, exponent, *, stride=1, padding=0,
                  tile_patches_target=4096, mxu_dtype=jnp.bfloat16):
    B, C, H, W = x.shape
    O, Ci, K, _ = weight.shape
    assert Ci == C

    patches, OH, OW = _im2col(x.astype(jnp.float32), K, stride, padding)
    patches = jnp.transpose(patches, (0, 4, 5, 1, 2, 3))   # (B, OH, OW, C, K, K)
    M = B * OH * OW
    R = C * K * K

    # Pack G patches per kernel row so the 128-lane output is dense.
    if O >= 128:
        G = 1
        lanes = pl.cdiv(O, 128) * 128
    else:
        G = 128 // O
        lanes = 128
    GR, OGR, GO = G * R, O * G * R, G * O

    mxu_bytes = jnp.dtype(mxu_dtype).itemsize
    M_pack = pl.cdiv(M, G)
    tile_pm, vmem_limit = _plan_tiles(M_pack, G, R, O, lanes, mxu_bytes,
                                      tile_patches_target)
    n_tiles = pl.cdiv(M_pack, tile_pm)
    M_pack_pad = n_tiles * tile_pm
    M_pad = M_pack_pad * G

    p_mat = patches.reshape(M, R)
    if M_pad != M:
        # TODO(synk): fold this pad into a fused in-kernel im2col gather; with
        # divisor-friendly tiles (as in the test shapes) the pad is skipped.
        p_mat = jnp.pad(p_mat, ((0, M_pad - M), (0, 0)))
    p_packed = p_mat.reshape(M_pack_pad, GR)                # pure reshape, R fast dim

    # Grid-invariant operands (column order [o][g][r]; output columns [g][o]).
    w_flat = weight.reshape(O, R).astype(jnp.float32)
    e_flat = exponent.reshape(O, R).astype(jnp.float32)
    e_all = jnp.broadcast_to(e_flat[:, None, :], (O, G, R)).reshape(1, OGR)

    rows = jnp.arange(OGR)
    cols = jnp.broadcast_to(
        jnp.arange(G)[None, :, None] * O + jnp.arange(O)[:, None, None], (O, G, R)
    ).reshape(-1)
    w_vals = jnp.broadcast_to(w_flat[:, None, :], (O, G, R)).reshape(-1)
    w_bd = jnp.zeros((OGR, lanes), mxu_dtype).at[rows, cols].set(
        w_vals.astype(mxu_dtype))

    b_row = jnp.zeros((1, lanes), jnp.float32)
    if bias is not None:
        b_row = b_row.at[0, :GO].set(jnp.tile(bias.astype(jnp.float32), G))

    grid = (M_pack_pad // tile_pm,)
    out = pl.pallas_call(
        _custom_conv_kernel,
        out_shape=jax.ShapeDtypeStruct((M_pack_pad, lanes), jnp.float32),
        grid=grid,
        in_specs=[
            pl.BlockSpec((tile_pm, GR), lambda i: (i, 0)),
            pl.BlockSpec((1, OGR), lambda i: (0, 0)),
            pl.BlockSpec((OGR, lanes), lambda i: (0, 0)),
            pl.BlockSpec((1, lanes), lambda i: (0, 0)),
        ],
        out_specs=pl.BlockSpec((tile_pm, lanes), lambda i: (i, 0)),
        compiler_params=pltpu.CompilerParams(
            dimension_semantics=("parallel",),
            vmem_limit_bytes=vmem_limit,
        ),
    )(p_packed, e_all, w_bd, b_row)

    out = out[:, :GO].reshape(M_pack_pad, G, O).reshape(M_pad, O)[:M]
    out = out.reshape(B, OH, OW, O)
    # TODO(synk): keep NHWC if the consumer accepts it; this transpose is kept
    # only to match the PyTorch module's NCHW output layout.
    return jnp.transpose(out, (0, 3, 1, 2))                 # (B, O, OH, OW)


def reference_custom_conv2d(x, weight, bias, exponent, *, stride=1, padding=0):
    """Pure-JAX reference mirroring the PyTorch forward exactly (f32)."""
    patches, OH, OW = _im2col(x, K=weight.shape[-1], stride=stride, pad=padding)
    x_exp = patches[:, None] ** exponent[None, :, :, :, :, None, None]
    out = (x_exp * weight[None, :, :, :, :, None, None]).sum(axis=(2, 3, 4))
    if bias is not None:
        out = out + bias[None, :, None, None]
    return out


if __name__ == "__main__":
    B, C, H, W = 2, 4, 16, 16
    O, K = 8, 3
    stride, padding = 1, 1

    key = jax.random.PRNGKey(0)
    kx, kw, kb = jax.random.split(key, 3)

    # Positive inputs (normalized pixel intensities) so x**exponent is
    # well-defined for arbitrary float exponents (matches torch.pow domain).
    x = jax.random.uniform(kx, (B, C, H, W), dtype=jnp.float32)
    # Parameter init per the module's __init__: weight/bias ~ randn, exponent = ones.
    weight = jax.random.normal(kw, (O, C, K, K), dtype=jnp.float32)
    bias = jax.random.normal(kb, (O,), dtype=jnp.float32)
    exponent = jnp.ones((O, C, K, K), dtype=jnp.float32)

    conv = jax.jit(functools.partial(custom_conv2d, stride=stride, padding=padding))
    out = jax.block_until_ready(conv(x, weight, bias, exponent))

    ref = reference_custom_conv2d(x, weight, bias, exponent,
                                  stride=stride, padding=padding)
    assert out.shape == (B, O, H, W), out.shape
    # Default path uses bf16 MXU operands with f32 accumulation (single MXU
    # pass); tolerance sized for bf16 operand rounding over the R=36 reduction.
    # Pass mxu_dtype=jnp.float32 for a high-precision (multi-pass) MXU path.
    max_err = float(jnp.max(jnp.abs(out - ref)))
    assert jnp.allclose(out, ref, rtol=2e-2, atol=3e-2), max_err

    print("KERNEL_OK")
</pallas_src>

<mosaic_0001>
module attributes {stable_mosaic.version = 11 : i64} {
  func.func @_custom_conv_kernel(%arg0: i32, %arg1: memref<16x576xf32, #tpu.memory_space<vmem>>, %arg2: memref<1x4608xf32, #tpu.memory_space<vmem>>, %arg3: memref<4608x128xbf16, #tpu.memory_space<vmem>>, %arg4: memref<1x128xf32, #tpu.memory_space<vmem>>, %arg5: memref<16x128xf32, #tpu.memory_space<vmem>>) attributes {dimension_semantics = [#tpu.dimension_semantics<parallel>], iteration_bounds = array<i64: 2>, scalar_prefetch = 0 : i64, scratch_operands = 0 : i64, tpu.core_type = #tpu.core_type<tc>, window_params = [{transform_indices = @transform_0, window_bounds = array<i64: 16, 576>}, {pipeline_mode = #tpu.pipeline_mode<synchronous>, transform_indices = @transform_1, window_bounds = array<i64: 1, 4608>}, {pipeline_mode = #tpu.pipeline_mode<synchronous>, transform_indices = @transform_2, window_bounds = array<i64: 4608, 128>}, {pipeline_mode = #tpu.pipeline_mode<synchronous>, transform_indices = @transform_3, window_bounds = array<i64: 1, 128>}, {transform_indices = @transform_4, window_bounds = array<i64: 16, 128>}]} {
    %c0 = arith.constant 0 : index
    %c0_0 = arith.constant 0 : index
    %0 = vector.load %arg1[%c0, %c0_0] : memref<16x576xf32, #tpu.memory_space<vmem>>, vector<16x576xf32>
    %c0_1 = arith.constant 0 : index
    %c0_2 = arith.constant 0 : index
    %1 = vector.load %arg2[%c0_1, %c0_2] : memref<1x4608xf32, #tpu.memory_space<vmem>>, vector<1x4608xf32>
    %cst = arith.constant 0.000000e+00 : f32
    %2 = vector.broadcast %cst : f32 to vector<16x576xf32>
    %3 = arith.cmpf ogt, %0, %2 : vector<16x576xf32>
    %4 = math.log %0 : vector<16x576xf32>
    %cst_3 = arith.constant -1.000000e+30 : f32
    %5 = vector.broadcast %cst_3 : f32 to vector<16x576xf32>
    %6 = arith.select %3, %4, %5 : vector<16x576xi1>, vector<16x576xf32>
    %7 = tpu.concatenate %6, %6, %6, %6, %6, %6, %6, %6 in 1 : vector<16x576xf32>, vector<16x576xf32>, vector<16x576xf32>, vector<16x576xf32>, vector<16x576xf32>, vector<16x576xf32>, vector<16x576xf32>, vector<16x576xf32> -> vector<16x4608xf32>
    %8 = vector.broadcast %1 : vector<1x4608xf32> to vector<16x4608xf32>
    %9 = arith.mulf %8, %7 : vector<16x4608xf32>
    %10 = math.exp %9 : vector<16x4608xf32>
    %11 = arith.truncf %10 : vector<16x4608xf32> to vector<16x4608xbf16>
    %c0_4 = arith.constant 0 : index
    %c0_5 = arith.constant 0 : index
    %12 = vector.load %arg3[%c0_4, %c0_5] : memref<4608x128xbf16, #tpu.memory_space<vmem>>, vector<4608x128xbf16>
    %cst_6 = arith.constant dense<0.000000e+00> : vector<16x128xf32>
    %13 = tpu.matmul %11, %12, %cst_6 {dimension_numbers = #tpu.dot_dimension_numbers<[1], [0], [0], [1], [0, 0, 1, 1], [], []>} : vector<16x4608xbf16>, vector<4608x128xbf16>, vector<16x128xf32> -> vector<16x128xf32>
    %c0_7 = arith.constant 0 : index
    %c0_8 = arith.constant 0 : index
    %14 = vector.load %arg4[%c0_7, %c0_8] : memref<1x128xf32, #tpu.memory_space<vmem>>, vector<1x128xf32>
    %15 = vector.broadcast %14 : vector<1x128xf32> to vector<16x128xf32>
    %16 = arith.addf %13, %15 : vector<16x128xf32>
    %c0_9 = arith.constant 0 : index
    %c0_10 = arith.constant 0 : index
    %17 = vector.load %arg5[%c0_9, %c0_10] : memref<16x128xf32, #tpu.memory_space<vmem>>, vector<16x128xf32>
    tpu.vector_store %arg5[%c0_9, %c0_10], %16 {strides = array<i32>} : memref<16x128xf32, #tpu.memory_space<vmem>>, vector<16x128xf32>,
    return
  }
  func.func @transform_0(%arg0: i32) -> (i32, i32) {
    %c0_i32 = arith.constant 0 : i32
    %c0_i32_0 = arith.constant 0 : i32
    return %arg0, %c0_i32 : i32, i32
  }
  func.func @transform_1(%arg0: i32) -> (i32, i32) {
    %c0_i32 = arith.constant 0 : i32
    %c0_i32_0 = arith.constant 0 : i32
    %c0_i32_1 = arith.constant 0 : i32
    return %c0_i32, %c0_i32_0 : i32, i32
  }
  func.func @transform_2(%arg0: i32) -> (i32, i32) {
    %c0_i32 = arith.constant 0 : i32
    %c0_i32_0 = arith.constant 0 : i32
    %c0_i32_1 = arith.constant 0 : i32
    return %c0_i32, %c0_i32_0 : i32, i32
  }
  func.func @transform_3(%arg0: i32) -> (i32, i32) {
    %c0_i32 = arith.constant 0 : i32
    %c0_i32_0 = arith.constant 0 : i32
    %c0_i32_1 = arith.constant 0 : i32
    return %c0_i32, %c0_i32_0 : i32, i32
  }
  func.func @transform_4(%arg0: i32) -> (i32, i32) {
    %c0_i32 = arith.constant 0 : i32
    %c0_i32_0 = arith.constant 0 : i32
    return %arg0, %c0_i32 : i32, i32
  }
}

</mosaic_0001>

<bundles_post_ra>
// kernel: tile.8
= control target key start
LH: loop header
LB: loop body
LE: loop exit
PB: predicated region body
PF: predicated region fallthrough
CT: control target
= control target key end

     0   :  { %s28_s0 = inlined_call_operand.vmem [shape: f32[8], index: 0, kind: input, shape index: {}]   ;;  %s29_s1 = inlined_call_operand.vmem [shape: f32[16,8], index: 1, kind: output, shape index: {}]  }
   0x1   :  { %v4_v0 = vld [vmem:[%s28_s0] ss:$0 sm:$0xff] }
   0x2   :  { %5 = vst [vmem:[%s29_s1] sm:$0xff] %v4_v0  ;;  %8 = vst [vmem:[%s29_s1 + $0x8] sm:$0xff] %v4_v0 }

// kernel: custom_conv2d.1
= control target key start
LH: loop header
LB: loop body
LE: loop exit
PB: predicated region body
PF: predicated region fallthrough
CT: control target
= control target key end

     0   :  { %s5050_s15 = smov 0   ;;  %s6570_s0 = inlined_call_operand.vmem [shape: f32[32,576], index: 0, kind: input, shape index: {}]   ;;  %s6571_s1 = inlined_call_operand.vmem [shape: f32[1,4608], index: 1, kind: input, shape index: {}]   ;;  %s6572_s2 = inlined_call_operand.vmem [shape: bf16[4608,128], index: 2, kind: input, shape index: {}]   ;;  %s6573_s3 = inlined_call_operand.vmem [shape: f32[1,128], index: 3, kind: input, shape index: {}]   ;;  %s6574_s4 = inlined_call_operand.vmem [shape: f32[32,128], index: 4, kind: output, shape index: {}]  }
   0x1 LB: > { %s3855_s16 = sadd.s32 4294967295, %s5022_s15   ;;  %p3859_p0 = scmp.ge.s32.totalorder %s5022_s15, 1  ;;  %s5022_s15 = sphi %s5050_s15, %s14_s15  }
   0x2   : > { %p164_p1 = scmp.lt.s32.totalorder %s5022_s15, 3 }
   0x4   : > { %p165_p2 = pnand %p3859_p0, %p164_p1 }
   0x6   : > { %168 = sbr.rel (%p165_p2) target bundleno = 622 (0x26e), region = 36 }
   0xb   : > { %s3860_s17 = sshll.u32 %s3855_s16, 1  ;;  %v316_v0 = vlaneseq  ;;  %v4561_v2 = vld [vmem:[%s6572_s2 + $0x78] sm:$0xff]   ;;  %v4564_v5 = vld [vmem:[%s6572_s2 + $0x70] sm:$0xff]   ;;  %v5111_v14 = vld [vmem:[%s6571_s1] sm:$0xff]  ;;  %s5024_s21 = smov 64   ;;  %vm290_vm10 = vcmask 523264  }
   0xc   : > { %p192_p3 = scmp.lt.s32.totalorder %s3860_s17, 3  ;;  %v4562_v3 = vld [vmem:[%s6572_s2 + $0x38] sm:$0xff]   ;;  %4155 = vmatprep.subr.bf16.mxu0 %v4561_v2  ;;  %v5120_v16 = vld [vmem:[%s6571_s1 + $0x10] sm:$0xff]  ;;  %v4568_v19 = vld [vmem:[%s6572_s2 + $0x68] sm:$0xff]  }
   0xd   : > { %v5058_v1 = vshrl.u32 %v316_v0, 7  ;;  %v4563_v4 = vld [vmem:[%s6572_s2 + $0xf8] sm:$0xff]   ;;  %4156 = vmatpush3.bf16.msra.mxu0 %v4562_v3  ;;  %v4566_v17 = vld [vmem:[%s6572_s2 + $0x30] sm:$0xff]   ;;  %v4570_v26 = vld [vmem:[%s6572_s2 + $0x28] sm:$0xff]  }
   0xe   : > { %s6600_s17 = smov (!%p192_p3, %s3860_s17), 3  ;;  %v5078_v6 = vld [vmem:[%s6571_s1 + $0x18] sm:$0xff]  ;;  %4177 = vmatprep.subr.bf16.mxu1 %v4563_v4  ;;  %4157 = vmatprep.subr.bf16.mxu0 %v4564_v5  ;;  %v4567_v18 = vld [vmem:[%s6572_s2 + $0xf0] sm:$0xff]   ;;  %v4571_v28 = vld [vmem:[%s6572_s2 + $0xe8] sm:$0xff]  }
   0xf   : > { %s4551_s26 = smul.u32 40, %s6600_s17  ;;  %v5081_v7 = vsub.s32 6, %v5058_v1  ;;  %v4565_v8 = vld [vmem:[%s6572_s2 + $0xb8] sm:$0xff]   ;;  %v5106_v13 = vsub.s32 4, %v5058_v1  ;;  %v4569_v22 = vld [vmem:[%s6572_s2 + $0xb0] sm:$0xff]   ;;  %v5148_v24 = vsub.s32 0, %v5058_v1 }
  0x10   : > { %4178 = vmatpush3.bf16.msra.mxu1 %v4565_v8  ;;  %v5157_v27 = vsub.s32 1, %v5058_v1  ;;  %v5163_v29 = vsub.s32 2, %v5058_v1  ;;  %v4572_v30 = vld [vmem:[%s6572_s2 + $0x60] sm:$0xff]   ;;  %v5170_v31 = vsub.s32 3, %v5058_v1  ;;  %v4573_v33 = vld [vmem:[%s6572_s2 + $0xa8] sm:$0xff]   ;;  %v5184_v35 = vsub.s32 5, %v5058_v1 }
  0x11   : > { %s5086_s5 = scalar_lea.vmem %s6570_s0, %s4551_s26  ;;  %v5102_v12 = vrot.slane %v5078_v6, %v5081_v7  ;;  %4158 = vmatpush3.bf16.msra.mxu0 %v4566_v17  ;;  %v5138_v21 = vrot.slane %v5111_v14, %v5106_v13  ;;  %4179 = vmatprep.subr.bf16.mxu1 %v4567_v18  ;;  %v5145_v23 = vrot.slane %v5120_v16, %v5081_v7  ;;  %v5181_v34 = vld [vmem:[%s6571_s1 + $0x8] sm:$0xff]  ;;  %v4574_v36 = vld [vmem:[%s6572_s2 + $0x20] sm:$0xff]   ;;  %v4576_v38 = vld [vmem:[%s6572_s2 + $0x58] sm:$0xff]   ;;  %s3863_s18 = sshll.u32 %s6600_s17, 3 }
  0x12   : > { %v5092_v9 = vld [vmem:[%s5086_s5 + $0x28] sm:$0xff]  ;;  %v5095_v10 = vld [vmem:[%s5086_s5] sm:$0xff]  ;;  %v5098_v11 = vld [vmem:[%s5086_s5 + $0x30] sm:$0xff]  ;;  %4159 = vmatprep.subr.bf16.mxu0 %v4568_v19  ;;  %v355_v40 = vrot.slane %v5181_v34, %v5157_v27  ;;  %v391_v41 = vrot.slane %v5120_v16, %v5163_v29  ;;  %v427_v42 = vrot.slane %v5078_v6, %v5170_v31  ;;  %v319_v48 = vrot.slane %v5111_v14, %v5148_v24  ;;  %s202_s22 = scalar_lea.vmem %s6574_s4, %s3863_s18 }
  0x13   : > { %4849 = vlog2.f32 %v5092_v9  ;;  %v5115_v15 = vld [vmem:[%s5086_s5 + $0x8] sm:$0xff]  ;;  %v5134_v20 = vld [vmem:[%s5086_s5 + $0x18] sm:$0xff]  ;;  %v5151_v25 = vld [vmem:[%s5086_s5 + $0x10] sm:$0xff]  ;;  %vm225_vm0 = vcmp.gt.f32.partialorder %v5092_v9, 0.0  ;;  %vm220_vm1 = vcmp.gt.f32.partialorder %v5095_v10, 0.0  ;;  %vm226_vm2 = vcmp.gt.f32.partialorder %v5098_v11, 0.0 }
  0x14   : > { %4851 = vlog2.f32 %v5095_v10  ;;  %4180 = vmatpush3.bf16.msra.mxu1 %v4569_v22  ;;  %v5173_v32 = vld [vmem:[%s5086_s5 + $0x40] sm:$0xff]  ;;  %v5210_v46 = vld [vmem:[%s5086_s5 + $0x38] sm:$0xff]  ;;  %v5224_v54 = vrot.slane %v5111_v14, %v5184_v35  ;;  %v5228_v55 = vrot.slane %v5181_v34, %v5081_v7  ;;  %v359_v60 = vrot.slane %v5181_v34, %v5163_v29  ;;  %v4580_v61 = vld [vmem:[%s6572_s2 + $0x50] sm:$0xff]  }
  0x15   : > { %4853 = vlog2.f32 %v5098_v11  ;;  %4160 = vmatpush3.bf16.msra.mxu0 %v4570_v26  ;;  %4181 = vmatprep.subr.bf16.mxu1 %v4571_v28  ;;  %v4575_v37 = vld [vmem:[%s6572_s2 + $0xe0] sm:$0xff]   ;;  %v4578_v50 = vld [vmem:[%s6572_s2 + $0x18] sm:$0xff]   ;;  %v323_v0 = vrot.slane %v5111_v14, %v5157_v27  ;;  %v5249_v2 = vld [vmem:[%s5086_s5 + $0x48] sm:$0xff]  ;;  %v395_v3 = vrot.slane %v5120_v16, %v5170_v31  ;;  %v431_v4 = vrot.slane %v5078_v6, %v5106_v13 }
  0x16   : > { %4855 = vlog2.f32 %v5115_v15  ;;  %4161 = vmatprep.subr.bf16.mxu0 %v4572_v30  ;;  %v4577_v43 = vld [vmem:[%s6572_s2 + $0xa0] sm:$0xff]   ;;  %v4579_v51 = vld [vmem:[%s6572_s2 + $0xd8] sm:$0xff]   ;;  %vm221_vm3 = vcmp.gt.f32.partialorder %v5115_v15, 0.0  ;;  %v4582_v28 = vld [vmem:[%s6572_s2 + $0x10] sm:$0xff]   ;;  %vm223_vm4 = vcmp.gt.f32.partialorder %v5134_v20, 0.0  ;;  %vm222_vm5 = vcmp.gt.f32.partialorder %v5151_v25, 0.0 }
  0x17   : > { %4857 = vlog2.f32 %v5134_v20  ;;  %v5259_v5 = vld [vmem:[%s5086_s5 + $0x20] sm:$0xff]  ;;  %v4581_v26 = vld [vmem:[%s6572_s2 + $0x98] sm:$0xff]   ;;  %v4583_v20 = vld [vmem:[%s6572_s2 + $0xd0] sm:$0xff]   ;;  %vm228_vm6 = vcmp.gt.f32.partialorder %v5173_v32, 0.0  ;;  %vm227_vm7 = vcmp.gt.f32.partialorder %v5210_v46, 0.0  ;;  %vm229_vm8 = vcmp.gt.f32.partialorder %v5249_v2, 0.0 }
  0x18   : > { %4859 = vlog2.f32 %v5151_v25  ;;  %4182 = vmatpush3.bf16.msra.mxu1 %v4573_v33  ;;  %vm224_vm9 = vcmp.gt.f32.partialorder %v5259_v5, 0.0 }
  0x19   : > { %4162 = vmatpush3.bf16.msra.mxu0 %v4574_v36  ;;  %4183 = vmatprep.subr.bf16.mxu1 %v4575_v37  ;;  %4861 = vlog2.f32 %v5173_v32 }
  0x1a   : > { %4163 = vmatprep.subr.bf16.mxu0 %v4576_v38  ;;  %4863 = vlog2.f32 %v5210_v46 }
  0x1b   : > { %4865 = vlog2.f32 %v5249_v2  ;;  %v4589_v2 = vld [vmem:[%s6572_s2 + $0x88] sm:$0xff]  }
  0x1c   : > { %4184 = vmatpush3.bf16.msra.mxu1 %v4577_v43  ;;  %4867 = vlog2.f32 %v5259_v5 }
  0x1d   : > { %4164 = vmatpush3.bf16.msra.mxu0 %v4578_v50  ;;  %4185 = vmatprep.subr.bf16.mxu1 %v4579_v51  ;;  %v331_v51 = vrot.slane %v5111_v14, %v5170_v31 }
  0x1e   : > { %4165 = vmatprep.subr.bf16.mxu0 %v4580_v61  ;;  %v435_v61 = vrot.slane %v5078_v6, %v5184_v35 }
  0x20   : > { %v4850_v39 = vpop.eup %4849  ;;  %4186 = vmatpush3.bf16.msra.mxu1 %v4581_v26 }
  0x21   : > { %v4852_v44 = vpop.eup %4851  ;;  %v241_v45 = vmul.f32 0.6931472, %v4850_v39  ;;  %4166 = vmatpush3.bf16.msra.mxu0 %v4582_v28  ;;  %4187 = vmatprep.subr.bf16.mxu1 %v4583_v20  ;;  %v327_v28 = vrot.slane %v5111_v14, %v5163_v29 }
  0x22   : > { %v4854_v47 = vpop.eup %4853  ;;  %v231_v49 = vmul.f32 0.6931472, %v4852_v44  ;;  %v403_v44 = vrot.slane %v5120_v16, %v5184_v35 }
  0x23   : > { %v255_v52 = vsel %vm225_vm0, %v241_v45, -1e+30  ;;  %v243_v53 = vmul.f32 0.6931472, %v4854_v47  ;;  %v4856_v56 = vpop.eup %4855 }
  0x24   : > { %280 = vrot.lane.b32.xlu1 %v255_v52, %s5024_s21  ;;  %v5231_v57 = vmul.f32 %v355_v40, %v255_v52  ;;  %v5233_v58 = vmul.f32 %v391_v41, %v255_v52  ;;  %v5235_v59 = vmul.f32 %v427_v42, %v255_v52  ;;  %v250_v62 = vsel %vm220_vm1, %v231_v49, -1e+30  ;;  %v4858_v17 = vpop.eup %4857 }
  0x25   : > { %v256_v63 = vsel %vm226_vm2, %v243_v53, -1e+30  ;;  %270 = vrot.lane.b32.xlu0 %v250_v62, %s5024_s21  ;;  %v5261_v8 = vmul.f32 %v355_v40, %v250_v62  ;;  %v5263_v9 = vmul.f32 %v391_v41, %v250_v62  ;;  %v5265_v10 = vmul.f32 %v427_v42, %v250_v62  ;;  %v4860_v37 = vpop.eup %4859 }
  0x26   : > { %v233_v11 = vmul.f32 0.6931472, %v4856_v56  ;;  %v532_v18 = vmul.f32 %v319_v48, %v255_v52  ;;  %v496_v19 = vmul.f32 %v319_v48, %v250_v62  ;;  %v5267_v22 = vmul.f32 %v359_v60, %v256_v63  ;;  %v4862_v48 = vpop.eup %4861 }
  0x27   : > { %v533_v30 = vmul.f32 %v323_v0, %v256_v63  ;;  %v5278_v33 = vmul.f32 %v395_v3, %v256_v63  ;;  %v5280_v36 = vmul.f32 %v431_v4, %v256_v63  ;;  %v237_v39 = vmul.f32 0.6931472, %v4858_v17 }
  0x28   : > { %282 = vrot.lane.b32.xlu1 %v256_v63, %s5024_s21  ;;  %v251_v38 = vsel %vm221_vm3, %v233_v11, -1e+30  ;;  %v367_v40 = vrot.slane %v5181_v34, %v5106_v13  ;;  %v640_v41 = vmul.f32 1.442695, %v532_v18  ;;  %v568_v42 = vmul.f32 1.442695, %v496_v19 }
  0x29   : > { %v497_v43 = vmul.f32 %v323_v0, %v251_v38  ;;  %272 = vrot.lane.b32.xlu0 %v251_v38, %s5024_s21  ;;  %v5290_v45 = vmul.f32 %v359_v60, %v251_v38  ;;  %v5292_v47 = vmul.f32 %v395_v3, %v251_v38  ;;  %v5294_v15 = vmul.f32 %v431_v4, %v251_v38  ;;  %v4584_v0 = vld [vmem:[%s6572_s2 + $0x48] sm:$0xff]   ;;  %v4864_v4 = vpop.eup %4863 }
  0x2a   : > { %v642_v49 = vmul.f32 1.442695, %v533_v30  ;;  %v253_v50 = vsel %vm223_vm4, %v237_v39, -1e+30  ;;  %v235_v52 = vmul.f32 0.6931472, %v4860_v37  ;;  %v363_v56 = vrot.slane %v5181_v34, %v5170_v31  ;;  %4167 = vmatprep.subr.bf16.mxu0 %v4584_v0  ;;  %v4866_v19 = vpop.eup %4865 }
  0x2b   : > { %v570_v53 = vmul.f32 1.442695, %v497_v43  ;;  %v399_v60 = vrot.slane %v5120_v16, %v5106_v13  ;;  %4869 = vpow2.f32 %v640_v41  ;;  %v5309_v62 = vmul.f32 %v367_v40, %v253_v50  ;;  %v4585_v16 = vld [vmem:[%s6572_s2 + $0x90] sm:$0xff]   ;;  %v4586_v3 = vld [vmem:[%s6572_s2 + $0x8] sm:$0xff]   ;;  %v4588_v37 = vld [vmem:[%s6572_s2 + $0x40] sm:$0xff]   ;;  %v4868_v38 = vpop.eup %4867 }
  0x2c   : > { %276 = vrot.lane.b32.xlu1 %v253_v50, %s5024_s21  ;;  %v5311_v63 = vmul.f32 %v403_v44, %v253_v50  ;;  %4871 = vpow2.f32 %v568_v42  ;;  %v5318_v34 = vmul.f32 %v5102_v12, %v253_v50  ;;  %v252_v13 = vsel %vm222_vm5, %v235_v52, -1e+30  ;;  %4188 = vmatpush3.bf16.msra.mxu1 %v4585_v16  ;;  %v4587_v30 = vld [vmem:[%s6572_s2 + $0xc8] sm:$0xff]   ;;  %v4590_v0 = vld [vmem:[%s6572_s2] sm:$0xff]  }
  0x2d   : > { %v247_v6 = vmul.f32 0.6931472, %v4862_v48  ;;  %4873 = vpow2.f32 %v642_v49  ;;  %274 = vrot.lane.b32.xlu0 %v252_v13, %s5024_s21  ;;  %v5329_v11 = vmul.f32 %v363_v56, %v252_v13  ;;  %4168 = vmatpush3.bf16.msra.mxu0 %v4586_v3  ;;  %v5331_v25 = vmul.f32 %v399_v60, %v252_v13 }
  0x2e   : > { %4875 = vpow2.f32 %v570_v53  ;;  %v5333_v17 = vmul.f32 %v435_v61, %v252_v13  ;;  %v499_v26 = vmul.f32 %v331_v51, %v253_v50  ;;  %4189 = vmatprep.subr.bf16.mxu1 %v4587_v30  ;;  %4169 = vmatprep.subr.bf16.mxu0 %v4588_v37  ;;  %v245_v43 = vmul.f32 0.6931472, %v4864_v4  ;;  %v4594_v30 = vld [vmem:[%s6572_s2 + $0x138] sm:$0xff]   ;;  %v4595_v37 = vld [vmem:[%s6572_s2 + $0x170] sm:$0xff]  }
  0x2f   : > { %v258_v18 = vsel %vm228_vm6, %v247_v6, -1e+30  ;;  %v249_v20 = vmul.f32 0.6931472, %v4866_v19  ;;  %v498_v49 = vmul.f32 %v327_v28, %v252_v13  ;;  %v5357_v50 = vsub.s32 7, %v5058_v1 }
  0x30   : > { %286 = vrot.lane.b32.xlu1 %v258_v18, %s5024_s21  ;;  %v5346_v39 = vmul.f32 %v367_v40, %v258_v18  ;;  %v535_v32 = vmul.f32 %v331_v51, %v258_v18  ;;  %v5349_v41 = vmul.f32 %v403_v44, %v258_v18  ;;  %v5352_v42 = vmul.f32 %v5102_v12, %v258_v18  ;;  %v4593_v18 = vld [vmem:[%s6572_s2 + $0x178] sm:$0xff]  }
  0x31   : > { %v574_v48 = vmul.f32 1.442695, %v499_v26  ;;  %v239_v40 = vmul.f32 0.6931472, %v4868_v38  ;;  %v257_v46 = vsel %vm227_vm7, %v245_v43, -1e+30  ;;  %4190 = vmatpush3.bf16.msra.mxu1 %v4589_v2  ;;  %4170 = vmatpush3.bf16.msra.mxu0 %v4590_v0  ;;  %v5385_v3 = vrot.slane %v5111_v14, %v5357_v50 }
  0x32   : > { %v5359_v44 = vsel %vm229_vm8, %v249_v20, -1e+30  ;;  %v646_v51 = vmul.f32 1.442695, %v535_v32  ;;  %v534_v12 = vmul.f32 %v327_v28, %v257_v46  ;;  %v543_v52 = vmul.f32 %v363_v56, %v257_v46  ;;  %284 = vrot.lane.b32.xlu0 %v257_v46, %s5024_s21  ;;  %v4591_v56 = vld [vmem:[%s6572_s2 + $0xc0] sm:$0xff]   ;;  %4199 = vmatprep.subr.bf16.mxu0 %v4593_v18  ;;  %v4596_v32 = vld [vmem:[%s6572_s2 + $0x130] sm:$0xff]  }
  0x33   : > { %v5361_v53 = vmul.f32 %v399_v60, %v257_v46  ;;  %v5369_v5 = vmul.f32 %v435_v61, %v257_v46  ;;  %v5371_v1 = vsel %vm224_vm9, %v239_v40, -1e+30  ;;  %v5381_v60 = vrot.slane %v5111_v14, %v5081_v7  ;;  %4191 = vmatprep.subr.bf16.mxu1 %v4591_v56  ;;  %v4592_v7 = vld [vmem:[%s6572_s2 + $0x80] sm:$0xff]   ;;  %v4597_v43 = vld [vmem:[%s6572_s2 + $0x168] sm:$0xff]   ;;  %v4605_v0 = vld [vmem:[%s6572_s2 + $0x158] sm:$0xff]  }
  0x34   : > { %288 = vrot.lane.b32.xlu1 %v5359_v44, %s5024_s21  ;;  %v572_v6 = vmul.f32 1.442695, %v498_v49  ;;  %4877 = vpow2.f32 %v574_v48  ;;  %v644_v61 = vmul.f32 1.442695, %v534_v12  ;;  %v658_v26 = vmul.f32 1.442695, %v5231_v57 }
  0x35   : > { %4879 = vpow2.f32 %v646_v51  ;;  %4192 = vmatpush3.bf16.msra.mxu1 %v4592_v7  ;;  %v586_v38 = vmul.f32 1.442695, %v5261_v8  ;;  %v4598_v57 = vld [vmem:[%s6572_s2 + $0x1f8] sm:$0xff]   ;;  %v660_v8 = vmul.f32 1.442695, %v5267_v22  ;;  %v4599_v48 = vld [vmem:[%s6572_s2 + $0x128] sm:$0xff]  }
  0x36   : > { %278 = vrot.lane.b32.xlu0 %v5371_v1, %s5024_s21  ;;  %4881 = vpow2.f32 %v572_v6  ;;  %4221 = vmatprep.subr.bf16.mxu1 %v4598_v57  ;;  %v588_v20 = vmul.f32 1.442695, %v5290_v45  ;;  %v4601_v40 = vld [vmem:[%s6572_s2 + $0x160] sm:$0xff]   ;;  %v590_v46 = vmul.f32 1.442695, %v5329_v11  ;;  %v4600_v11 = vld [vmem:[%s6572_s2 + $0x1b8] sm:$0xff]  }
  0x37   : > { %4883 = vpow2.f32 %v644_v61  ;;  %v662_v12 = vmul.f32 1.442695, %v543_v52  ;;  %v4603_v45 = vld [vmem:[%s6572_s2 + $0x120] sm:$0xff]   ;;  %v4602_v52 = vld [vmem:[%s6572_s2 + $0x1f0] sm:$0xff]   ;;  %v4607_v6 = vld [vmem:[%s6572_s2 + $0x118] sm:$0xff]  }
  0x38   : > { %v4870_v13 = vpop.eup %4869  ;;  %4885 = vpow2.f32 %v658_v26  ;;  %v4604_v61 = vld [vmem:[%s6572_s2 + $0x1b0] sm:$0xff]   ;;  %v4612_v57 = vld [vmem:[%s6572_s2 + $0x1a0] sm:$0xff]  }
  0x39   : > { %v4872_v16 = vpop.eup %4871  ;;  %4887 = vpow2.f32 %v586_v38  ;;  %v4611_v7 = vld [vmem:[%s6572_s2 + $0x110] sm:$0xff]  }
  0x3a   : > { %v4874_v4 = vpop.eup %4873  ;;  %v712_v28 = vpack.c.bf16 %v4870_v13, %v4872_v16  ;;  %4889 = vpow2.f32 %v660_v8  ;;  %v4609_v16 = vld [vmem:[%s6572_s2 + $0x150] sm:$0xff]  }
  0x3b   : > { %v4876_v19 = vpop.eup %4875  ;;  %4891 = vpow2.f32 %v588_v20  ;;  %v4619_v20 = vld [vmem:[%s6572_s2 + $0x100] sm:$0xff]  }
  0x3c   : > { %v713_v14 = vpack.c.bf16 %v4874_v4, %v4876_v19  ;;  %4893 = vpow2.f32 %v590_v46  ;;  %v4606_v4 = vld [vmem:[%s6572_s2 + $0x1e8] sm:$0xff]   ;;  %v4616_v46 = vld [vmem:[%s6572_s2 + $0x198] sm:$0xff]  }
  0x3d   : > { %4895 = vpow2.f32 %v662_v12  ;;  %v4613_v19 = vld [vmem:[%s6572_s2 + $0x148] sm:$0xff]  }
  0x3e   : > { %3091 = vmatprep.mubr.bf16.mxu0 %v713_v14  ;;  %v4610_v14 = vld [vmem:[%s6572_s2 + $0x1e0] sm:$0xff]  }
  0x3f   : > { %3092 = vmatmul.mubr.bf16.vlgmr.msra.gmra.mxu0 %v712_v28  ;;  %v4608_v28 = vld [vmem:[%s6572_s2 + $0x1a8] sm:$0xff]  }
  0x40   : > { %4200 = vmatpush3.bf16.msra.mxu0 %v4594_v30  ;;  %v4615_v30 = vld [vmem:[%s6572_s2 + $0x108] sm:$0xff]  }
  0x41   : > { %4201 = vmatprep.subr.bf16.mxu0 %v4595_v37  ;;  %v4878_v49 = vpop.eup %4877  ;;  %v4617_v37 = vld [vmem:[%s6572_s2 + $0x140] sm:$0xff]  }
  0x42   : > { %v4880_v51 = vpop.eup %4879 }
  0x43   : > { %v715_v22 = vpack.c.bf16 %v4880_v51, %v4878_v49  ;;  %v4882_v2 = vpop.eup %4881  ;;  %v4622_v49 = vld [vmem:[%s6572_s2 + $0x278] sm:$0xff]   ;;  %v4618_v51 = vld [vmem:[%s6572_s2 + $0x1d0] sm:$0xff]  }
  0x44   : > { %4202 = vmatpush3.bf16.msra.mxu0 %v4596_v32  ;;  %v4884_v56 = vpop.eup %4883 }
  0x45   : > { %4203 = vmatprep.subr.bf16.mxu0 %v4597_v43  ;;  %3132 = vmatprep.mubr.bf16.mxu1 %v715_v22  ;;  %v714_v13 = vpack.c.bf16 %v4884_v56, %v4882_v2  ;;  %v5448_v18 = vpop.eup %4885  ;;  %v4614_v43 = vld [vmem:[%s6572_s2 + $0x1d8] sm:$0xff]   ;;  %v4620_v2 = vld [vmem:[%s6572_s2 + $0x190] sm:$0xff]   ;;  %v4623_v56 = vld [vmem:[%s6572_s2 + $0x188] sm:$0xff]  }
  0x46   : > { %v5453_v26 = vpop.eup %4887 }
  0x47   : > { %3133 = vmatmul.mubr.bf16.vlgmr.msra.gmra.mxu1 %v714_v13  ;;  %v5472_v32 = vpop.eup %4889 }
  0x48   : > { %4204 = vmatpush3.bf16.msra.mxu0 %v4599_v48  ;;  %4222 = vmatpush3.bf16.msra.mxu1 %v4600_v11  ;;  %v5477_v8 = vpop.eup %4891  ;;  %v664_v11 = vmul.f32 1.442695, %v5346_v39  ;;  %v4630_v39 = vld [vmem:[%s6572_s2 + $0x2f8] sm:$0xff]  }
  0x49   : > { %4205 = vmatprep.subr.bf16.mxu0 %v4601_v40  ;;  %4223 = vmatprep.subr.bf16.mxu1 %v4602_v52  ;;  %v5482_v48 = vpop.eup %4893  ;;  %v4627_v52 = vld [vmem:[%s6572_s2 + $0x180] sm:$0xff]  }
  0x4a   : > { %v5487_v40 = vpop.eup %4895 }
  0x4c   : > { %4206 = vmatpush3.bf16.msra.mxu0 %v4603_v45  ;;  %4224 = vmatpush3.bf16.msra.mxu1 %v4604_v61  ;;  %v592_v45 = vmul.f32 1.442695, %v5309_v62  ;;  %v4625_v62 = vld [vmem:[%s6572_s2 + $0x1c0] sm:$0xff]   ;;  %v676_v61 = vmul.f32 1.442695, %v5233_v58 }
  0x4d   : > { %4207 = vmatprep.subr.bf16.mxu0 %v4605_v0  ;;  %4225 = vmatprep.subr.bf16.mxu1 %v4606_v4  ;;  %v4621_v0 = vld [vmem:[%s6572_s2 + $0x1c8] sm:$0xff]   ;;  %v678_v4 = vmul.f32 1.442695, %v5278_v33  ;;  %v608_v33 = vmul.f32 1.442695, %v5331_v25 }
  0x4e   : > { %4897 = vpow2.f32 %v592_v45  ;;  %v5552_v25 = vld [vmem:[%s6571_s1 + $0x20] sm:$0xf] }
  0x4f   : > { %4899 = vpow2.f32 %v664_v11 }
  0x50   : > { %4208 = vmatpush3.bf16.msra.mxu0 %v4607_v6  ;;  %4226 = vmatpush3.bf16.msra.mxu1 %v4608_v28  ;;  %4901 = vpow2.f32 %v676_v61  ;;  %v610_v28 = vmul.f32 1.442695, %v5311_v63 }
  0x51   : > { %4209 = vmatprep.subr.bf16.mxu0 %v4609_v16  ;;  %4227 = vmatprep.subr.bf16.mxu1 %v4610_v14  ;;  %4903 = vpow2.f32 %v678_v4  ;;  %v5533_v14 = vld [vmem:[%s6571_s1 + $0x18] sm:$0xff] }
  0x52   : > { %v443_v58 = vrot.slane %v5533_v14, %v5357_v50 }
  0x54   : > { %4210 = vmatpush3.bf16.msra.mxu0 %v4611_v7  ;;  %4228 = vmatpush3.bf16.msra.mxu1 %v4612_v57  ;;  %v606_v7 = vmul.f32 1.442695, %v5292_v47  ;;  %v682_v47 = vmul.f32 1.442695, %v5349_v41 }
  0x55   : > { %4211 = vmatprep.subr.bf16.mxu0 %v4613_v19  ;;  %4229 = vmatprep.subr.bf16.mxu1 %v4614_v43  ;;  %v604_v19 = vmul.f32 1.442695, %v5263_v9 }
  0x56   : > { %4905 = vpow2.f32 %v606_v7 }
  0x57   : > { %4907 = vpow2.f32 %v604_v19 }
  0x58   : > { %4212 = vmatpush3.bf16.msra.mxu0 %v4615_v30  ;;  %4230 = vmatpush3.bf16.msra.mxu1 %v4616_v46  ;;  %v680_v30 = vmul.f32 1.442695, %v5361_v53  ;;  %4909 = vpow2.f32 %v610_v28 }
  0x59   : > { %4213 = vmatprep.subr.bf16.mxu0 %v4617_v37  ;;  %4231 = vmatprep.subr.bf16.mxu1 %v4618_v51  ;;  %4911 = vpow2.f32 %v608_v33 }
  0x5a   : > { %4913 = vpow2.f32 %v682_v47 }
  0x5b   : > { %v5519_v13 = vpop.eup %4897  ;;  %4915 = vpow2.f32 %v680_v30  ;;  %v5595_v30 = vrot.slane %v5533_v14, %v5157_v27 }
  0x5c   : > { %4214 = vmatpush3.bf16.msra.mxu0 %v4619_v20  ;;  %4232 = vmatpush3.bf16.msra.mxu1 %v4620_v2  ;;  %v5521_v6 = vpop.eup %4899 }
  0x5d   : > { %4243 = vmatprep.subr.bf16.mxu0 %v4622_v49  ;;  %4233 = vmatprep.subr.bf16.mxu1 %v4621_v0  ;;  %v5563_v49 = vld [vmem:[%s6571_s1 + $0x10] sm:$0xff]  ;;  %v447_v0 = vrot.slane %v5552_v25, %v5148_v24 }
  0x5e   : > { %v411_v46 = vrot.slane %v5563_v49, %v5357_v50 }
  0x60   : > { %4234 = vmatpush3.bf16.msra.mxu1 %v4623_v56  ;;  %v5578_v56 = vrot.slane %v5563_v49, %v5148_v24 }
  0x61   : > { %4235 = vmatprep.subr.bf16.mxu1 %v4625_v62  ;;  %v5580_v62 = vpop.eup %4901 }
  0x62   : > { %6578 = vst [vmem:[#allocation2_spill] sm:$0xff] %v5580_v62  ;;  %v5584_v7 = vpop.eup %4903 }
  0x63   : > { %v5587_v33 = vpop.eup %4905 }
  0x64   : > { %4236 = vmatpush3.bf16.msra.mxu1 %v4627_v52  ;;  %6579 = vst [vmem:[#allocation3_spill] sm:$0xff] %v5587_v33 }
  0x65   : > { %4265 = vmatprep.subr.bf16.mxu1 %v4630_v39 }
  0x96   : > { %v281_v9 = vpop.permute.xlu1 %280 }
  0x97   : > { %v5542_v37 = vsel %vm290_vm10, %v5359_v44, %v281_v9  ;;  %v271_v20 = vpop.permute.xlu0 %270 }
  0x98   : > { %v536_v63 = vmul.f32 %v5138_v21, %v5542_v37  ;;  %v554_v57 = vmul.f32 %v5145_v23, %v5542_v37  ;;  %v563_v43 = vmul.f32 %v443_v58, %v5542_v37  ;;  %v5556_v41 = vsel %vm290_vm10, %v5371_v1, %v271_v20 }
  0x99   : > { %v500_v53 = vmul.f32 %v5138_v21, %v5556_v41  ;;  %v518_v1 = vmul.f32 %v5145_v23, %v5556_v41  ;;  %v527_v2 = vmul.f32 %v443_v58, %v5556_v41 }
  0x9a   : > { %v648_v44 = vmul.f32 1.442695, %v536_v63  ;;  %v5567_v51 = vpop.permute.xlu1 %282  ;;  %v684_v45 = vmul.f32 1.442695, %v554_v57  ;;  %v702_v21 = vmul.f32 1.442695, %v563_v43  ;;  %v5597_v63 = vpop.eup %4907 }
  0x9b   : > { %v295_v11 = vsel %vm290_vm10, %v281_v9, %v5567_v51  ;;  %v576_v52 = vmul.f32 1.442695, %v500_v53  ;;  %v273_v4 = vpop.permute.xlu0 %272  ;;  %v612_v19 = vmul.f32 1.442695, %v518_v1  ;;  %v630_v47 = vmul.f32 1.442695, %v527_v2 }
  0x9c   : > { %4917 = vpow2.f32 %v648_v44  ;;  %v537_v23 = vmul.f32 %v5224_v54, %v295_v11  ;;  %v546_v39 = vmul.f32 %v5228_v55, %v295_v11  ;;  %v555_v61 = vmul.f32 %v411_v46, %v295_v11  ;;  %6580 = vst [vmem:[#allocation4_spill] sm:$0xff] %v5597_v63 }
  0x9d   : > { %4919 = vpow2.f32 %v684_v45  ;;  %v564_v28 = vmul.f32 %v447_v0, %v295_v11  ;;  %v291_v58 = vsel %vm290_vm10, %v271_v20, %v273_v4  ;;  %v5591_v9 = vrot.slane %v5533_v14, %v5148_v24 }
  0x9e   : > { %4921 = vpow2.f32 %v702_v21  ;;  %v650_v57 = vmul.f32 1.442695, %v537_v23  ;;  %v668_v43 = vmul.f32 1.442695, %v546_v39  ;;  %v501_v44 = vmul.f32 %v5224_v54, %v291_v58  ;;  %v5601_v1 = vpop.permute.xlu1 %276 }
  0x9f   : > { %v510_v20 = vmul.f32 %v5228_v55, %v291_v58  ;;  %4923 = vpow2.f32 %v576_v52  ;;  %v519_v53 = vmul.f32 %v411_v46, %v291_v58  ;;  %v528_v45 = vmul.f32 %v447_v0, %v291_v58  ;;  %v275_v55 = vpop.permute.xlu0 %274  ;;  %v5611_v0 = vpop.eup %4909 }
  0xa0   : > { %v451_v2 = vrot.slane %v5552_v25, %v5157_v27  ;;  %4925 = vpow2.f32 %v612_v19  ;;  %v686_v21 = vmul.f32 1.442695, %v555_v61  ;;  %v455_v11 = vrot.slane %v5552_v25, %v5163_v29  ;;  %v5618_v19 = vpop.eup %4911 }
  0xa1   : > { %4927 = vpow2.f32 %v630_v47  ;;  %v578_v54 = vmul.f32 1.442695, %v501_v44  ;;  %v596_v39 = vmul.f32 1.442695, %v510_v20  ;;  %v5614_v52 = vsel %vm290_vm10, %v273_v4, %v275_v55  ;;  %v5622_v44 = vpop.eup %4913 }
  0xa2   : > { %4929 = vpow2.f32 %v650_v57  ;;  %v293_v61 = vsel %vm290_vm10, %v275_v55, %v5601_v1  ;;  %v614_v58 = vmul.f32 1.442695, %v519_v53  ;;  %v502_v47 = vmul.f32 %v5381_v60, %v5614_v52  ;;  %v5630_v53 = vpop.eup %4915  ;;  %v287_v22 = vpop.permute.xlu1 %286 }
  0xa3   : > { %4931 = vpow2.f32 %v668_v43  ;;  %v503_v20 = vmul.f32 %v5385_v3, %v293_v61  ;;  %v512_v46 = vmul.f32 %v5578_v56, %v293_v61  ;;  %v520_v4 = vmul.f32 %v5591_v9, %v5614_v52 }
  0xa4   : > { %v521_v57 = vmul.f32 %v5595_v30, %v293_v61  ;;  %4933 = vpow2.f32 %v686_v21  ;;  %v704_v55 = vmul.f32 1.442695, %v564_v28  ;;  %v529_v23 = vmul.f32 %v451_v2, %v5614_v52 }
  0xa5   : > { %v530_v43 = vmul.f32 %v455_v11, %v293_v61  ;;  %4935 = vpow2.f32 %v578_v54  ;;  %v632_v16 = vmul.f32 1.442695, %v528_v45  ;;  %v580_v38 = vmul.f32 1.442695, %v502_v47  ;;  %v285_v61 = vpop.permute.xlu0 %284 }
  0xa6   : > { %4937 = vpow2.f32 %v596_v39  ;;  %v582_v63 = vmul.f32 1.442695, %v503_v20  ;;  %v600_v33 = vmul.f32 1.442695, %v512_v46  ;;  %v616_v28 = vmul.f32 1.442695, %v520_v4 }
  0xa7   : > { %4939 = vpow2.f32 %v614_v58  ;;  %v423_v54 = vrot.slane %v5533_v14, %v5163_v29  ;;  %v459_v45 = vrot.slane %v5552_v25, %v5170_v31  ;;  %v618_v39 = vmul.f32 1.442695, %v521_v57  ;;  %v289_v14 = vpop.permute.xlu1 %288 }
  0xa8   : > { %4941 = vpow2.f32 %v704_v55  ;;  %v5644_v58 = vsel %vm290_vm10, %v5567_v51, %v285_v61  ;;  %v297_v47 = vsel %vm290_vm10, %v285_v61, %v287_v22 }
  0xa9   : > { %v5632_v12 = vpop.eup %4917  ;;  %4943 = vpow2.f32 %v632_v16  ;;  %v634_v16 = vmul.f32 1.442695, %v529_v23  ;;  %v538_v20 = vmul.f32 %v5381_v60, %v5644_v58  ;;  %v539_v29 = vmul.f32 %v5385_v3, %v297_v47 }
  0xaa   : > { %v5634_v62 = vpop.eup %4919  ;;  %4945 = vpow2.f32 %v580_v38  ;;  %v548_v31 = vmul.f32 %v5578_v56, %v297_v47  ;;  %v556_v38 = vmul.f32 %v5591_v9, %v5644_v58  ;;  %v557_v25 = vmul.f32 %v5595_v30, %v297_v47  ;;  %v279_v56 = vpop.permute.xlu0 %278 }
  0xab   : > { %v5636_v21 = vpop.eup %4921  ;;  %4947 = vpow2.f32 %v582_v63  ;;  %v565_v63 = vmul.f32 %v451_v2, %v5644_v58  ;;  %v566_v23 = vmul.f32 %v455_v11, %v297_v47  ;;  %v652_v60 = vmul.f32 1.442695, %v538_v20 }
  0xac   : > { %v5647_v46 = vpop.eup %4923  ;;  %4949 = vpow2.f32 %v600_v33  ;;  %v636_v3 = vmul.f32 1.442695, %v530_v43  ;;  %v654_v55 = vmul.f32 1.442695, %v539_v29  ;;  %v5662_v33 = vsel %vm290_vm10, %v287_v22, %v289_v14 }
  0xad   : > { %v5652_v4 = vpop.eup %4925  ;;  %4951 = vpow2.f32 %v616_v28  ;;  %v5667_v9 = vmul.f32 1.442695, %v5235_v59  ;;  %v5670_v30 = vmul.f32 1.442695, %v5265_v10  ;;  %v672_v2 = vmul.f32 1.442695, %v548_v31 }
  0xae   : > { %v5658_v51 = vpop.eup %4927  ;;  %4953 = vpow2.f32 %v618_v39  ;;  %v688_v11 = vmul.f32 1.442695, %v556_v38  ;;  %v690_v28 = vmul.f32 1.442695, %v557_v25  ;;  %v558_v22 = vmul.f32 %v423_v54, %v5662_v33 }
  0xaf   : > { %v4930_v57 = vpop.eup %4929  ;;  %4955 = vpow2.f32 %v634_v16  ;;  %v567_v43 = vmul.f32 %v459_v45, %v5662_v33  ;;  %v5678_v47 = vsel %vm290_vm10, %v5601_v1, %v279_v56  ;;  %v5681_v10 = vmul.f32 1.442695, %v5280_v36 }
  0xb0   : > { %v5664_v61 = vpop.eup %4931  ;;  %4957 = vpow2.f32 %v652_v60  ;;  %v5684_v16 = vmul.f32 1.442695, %v5294_v15  ;;  %v706_v20 = vmul.f32 1.442695, %v565_v63  ;;  %v5689_v14 = vmul.f32 1.442695, %v5318_v34 }
  0xb1   : > { %v5672_v39 = vpop.eup %4933  ;;  %4959 = vpow2.f32 %v654_v55  ;;  %v708_v31 = vmul.f32 1.442695, %v566_v23  ;;  %v5694_v1 = vmul.f32 1.442695, %v5333_v17  ;;  %v522_v36 = vmul.f32 %v423_v54, %v5678_v47  ;;  %v4624_v23 = vld [vmem:[%s6572_s2 + $0x238] sm:$0xff]   ;;  %v5714_v54 = vld [vmem:[%s6571_s1 + $0x8] sm:$0xff] }
  0xb2   : > { %v4936_v59 = vpop.eup %4935  ;;  %4961 = vpow2.f32 %v636_v3  ;;  %v531_v15 = vmul.f32 %v459_v45, %v5678_v47  ;;  %v5701_v63 = vmul.f32 1.442695, %v5352_v42  ;;  %v5709_v17 = vmul.f32 1.442695, %v5369_v5  ;;  %v4628_v5 = vld [vmem:[%s6572_s2 + $0x230] sm:$0xff]  }
  0xb3   : > { %v5686_v29 = vpop.eup %4937  ;;  %4963 = vpow2.f32 %v672_v2  ;;  %v717_v34 = vpack.c.bf16 %v4930_v57, %v4936_v59  ;;  %v371_v42 = vrot.slane %v5714_v54, %v5184_v35  ;;  %v716_v45 = vpack.c.bf16 %v5632_v12, %v5647_v46  ;;  %v4626_v57 = vld [vmem:[%s6572_s2 + $0x270] sm:$0xff]   ;;  %v4629_v2 = vld [vmem:[%s6572_s2 + $0x268] sm:$0xff]  }
  0xb4   : > { %v5691_v38 = vpop.eup %4939  ;;  %4965 = vpow2.f32 %v688_v11  ;;  %v692_v56 = vmul.f32 1.442695, %v558_v22  ;;  %v710_v22 = vmul.f32 1.442695, %v567_v43  ;;  %v638_v59 = vmul.f32 1.442695, %v531_v15 }
  0xb5   : > { %v5698_v25 = vpop.eup %4941  ;;  %4967 = vpow2.f32 %v690_v28  ;;  %3173 = vmatprep.mubr.bf16.mxu0 %v717_v34  ;;  %v6581_v34 = vpack.c.bf16 %v5448_v18, %v5453_v26  ;;  %v620_v28 = vmul.f32 1.442695, %v522_v36  ;;  %v4631_v18 = vld [vmem:[%s6572_s2 + $0x228] sm:$0xff]   ;;  %v4632_v36 = vld [vmem:[%s6572_s2 + $0x2b8] sm:$0xff]   ;;  %v4633_v15 = vld [vmem:[%s6572_s2 + $0x260] sm:$0xff]  }
  0xb6   : > { %v5706_v60 = vpop.eup %4943  ;;  %4969 = vpow2.f32 %v706_v20  ;;  %3174 = vmatmul.mubr.bf16.vlgmr.msra.gmra.mxu0 %v716_v45  ;;  %v4635_v45 = vld [vmem:[%s6572_s2 + $0x220] sm:$0xff]  }
  0xb7   : > { %v4946_v3 = vpop.eup %4945  ;;  %4971 = vpow2.f32 %v708_v31  ;;  %v351_v31 = vrot.slane %v5714_v54, %v5148_v24  ;;  %4244 = vmatpush3.bf16.msra.mxu0 %v4624_v23  ;;  %3255 = vmatprep.mubr.bf16.mxu0 %v6581_v34  ;;  %v545_v24 = vmul.f32 %v371_v42, %v5542_v37 }
  0xb8   : > { %v4948_v46 = vpop.eup %4947  ;;  %4245 = vmatprep.subr.bf16.mxu0 %v4626_v57  ;;  %4973 = vpow2.f32 %v692_v56  ;;  %v4634_v56 = vld [vmem:[%s6572_s2 + $0x2f0] sm:$0xff]  }
  0xb9   : > { %v5741_v20 = vpop.eup %4949  ;;  %v540_v43 = vmul.f32 %v351_v31, %v5662_v33  ;;  %4975 = vpow2.f32 %v710_v22  ;;  %v504_v37 = vmul.f32 %v351_v31, %v5678_v47  ;;  %v666_v31 = vmul.f32 1.442695, %v545_v24  ;;  %v4638_v24 = vld [vmem:[%s6572_s2 + $0x2e8] sm:$0xff]  }
  0xba   : > { %v5750_v11 = vpop.eup %4951  ;;  %4977 = vpow2.f32 %v620_v28 }
  0xbb   : > { %v5752_v35 = vpop.eup %4953  ;;  %4246 = vmatpush3.bf16.msra.mxu0 %v4628_v5  ;;  %v509_v5 = vmul.f32 %v371_v42, %v5556_v41  ;;  %4979 = vpow2.f32 %v638_v59  ;;  %v656_v28 = vmul.f32 1.442695, %v540_v43  ;;  %v4636_v41 = vld [vmem:[%s6572_s2 + $0x2b0] sm:$0xff]   ;;  %v584_v59 = vmul.f32 1.442695, %v504_v37 }
  0xbc   : > { %v5754_v12 = vpop.eup %4955  ;;  %4247 = vmatprep.subr.bf16.mxu0 %v4629_v2  ;;  %4981 = vpow2.f32 %v666_v31 }
  0xbd   : > { %v4958_v26 = vpop.eup %4957  ;;  %v594_v43 = vmul.f32 1.442695, %v509_v5  ;;  %4983 = vpow2.f32 %v656_v28  ;;  %v4643_v5 = vld [vmem:[%s6572_s2 + $0x210] sm:$0xff]   ;;  %v4644_v28 = vld [vmem:[%s6572_s2 + $0x2a0] sm:$0xff]  }
  0xbe   : > { %v4960_v23 = vpop.eup %4959  ;;  %v718_v57 = vpack.c.bf16 %v4958_v26, %v4946_v3  ;;  %v4637_v3 = vld [vmem:[%s6572_s2 + $0x258] sm:$0xff]   ;;  %4985 = vpow2.f32 %v584_v59 }
  0xbf   : > { %v5771_v22 = vpop.eup %4961  ;;  %v719_v34 = vpack.c.bf16 %v4960_v23, %v4948_v46  ;;  %4248 = vmatpush3.bf16.msra.mxu0 %v4631_v18  ;;  %v6582_v23 = vpack.c.bf16 %v5487_v40, %v5482_v48  ;;  %v4640_v48 = vld [vmem:[%s6572_s2 + $0x2a8] sm:$0xff]   ;;  %4987 = vpow2.f32 %v594_v43 }
  0xc0   : > { %v5777_v55 = vpop.eup %4963  ;;  %4249 = vmatprep.subr.bf16.mxu0 %v4633_v15  ;;  %v4639_v15 = vld [vmem:[%s6572_s2 + $0x218] sm:$0xff]   ;;  %v4647_v43 = vld [vmem:[%s6572_s2 + $0x208] sm:$0xff]   ;;  %4989 = vpow2.f32 %v5667_v9  ;;  %v4651_v9 = vld [vmem:[%s6572_s2 + $0x200] sm:$0xff]  }
  0xc1   : > { %v5782_v2 = vpop.eup %4965  ;;  %3214 = vmatprep.mubr.bf16.mxu1 %v719_v34  ;;  %v728_v42 = vpack.c.bf16 %v5777_v55, %v5741_v20  ;;  %4991 = vpow2.f32 %v5670_v30  ;;  %v4654_v30 = vld [vmem:[%s6572_s2 + $0x378] sm:$0xff]   ;;  %v4725_v55 = vld [vmem:[%s6572_s2 + $0x568] sm:$0xff]   ;;  %v4723_v20 = vld [vmem:[%s6572_s2 + $0x480] sm:$0xff]  }
  0xc2   : > { %v5789_v46 = vpop.eup %4967  ;;  %3215 = vmatmul.mubr.bf16.vlgmr.msra.gmra.mxu1 %v718_v57  ;;  %v736_v26 = vpack.c.bf16 %v5782_v2, %v5750_v11  ;;  %v4789_v11 = vld [vmem:[%s6572_s2 + $0x768] sm:$0xff]   ;;  %v4787_v2 = vld [vmem:[%s6572_s2 + $0x680] sm:$0xff]  }
  0xc3   : > { %v5796_v18 = vpop.eup %4969  ;;  %4266 = vmatpush3.bf16.msra.mxu1 %v4632_v36  ;;  %3296 = vmatprep.mubr.bf16.mxu1 %v6582_v23  ;;  %v737_v37 = vpack.c.bf16 %v5789_v46, %v5752_v35  ;;  %v4641_v36 = vld [vmem:[%s6572_s2 + $0x250] sm:$0xff]   ;;  %v4758_v35 = vld [vmem:[%s6572_s2 + $0x6f8] sm:$0xff]   ;;  %v4759_v46 = vld [vmem:[%s6572_s2 + $0x628] sm:$0xff]  }
  0xc4   : > { %v5803_v57 = vpop.eup %4971  ;;  %4267 = vmatprep.subr.bf16.mxu1 %v4634_v56  ;;  %v745_v34 = vpack.c.bf16 %v5796_v18, %v5754_v12  ;;  %4250 = vmatpush3.bf16.msra.mxu0 %v4635_v45  ;;  %v379_v56 = vrot.slane %v5714_v54, %v5357_v50  ;;  %v4642_v45 = vld [vmem:[%s6572_s2 + $0x2e0] sm:$0xff]   ;;  %v4645_v54 = vld [vmem:[%s6572_s2 + $0x248] sm:$0xff]   ;;  %v4822_v12 = vld [vmem:[%s6572_s2 + $0x8f8] sm:$0xff]  }
  0xc5   : > { %v746_v40 = vpack.c.bf16 %v5803_v57, %v5771_v22  ;;  %4251 = vmatprep.subr.bf16.mxu0 %v4637_v3  ;;  %v5826_v31 = vpop.eup %4973  ;;  %v4823_v18 = vld [vmem:[%s6572_s2 + $0x828] sm:$0xff]  }
  0xc6   : > { %v547_v3 = vmul.f32 %v379_v56, %v5644_v58  ;;  %v5832_v50 = vpop.eup %4975  ;;  %v511_v59 = vmul.f32 %v379_v56, %v5614_v52  ;;  %v4646_v58 = vld [vmem:[%s6572_s2 + $0x2d8] sm:$0xff]  }
  0xc7   : > { %4268 = vmatpush3.bf16.msra.mxu1 %v4636_v41  ;;  %v5837_v41 = vpop.eup %4977  ;;  %v4648_v52 = vld [vmem:[%s6572_s2 + $0x298] sm:$0xff]  }
  0xc8   : > { %4269 = vmatprep.subr.bf16.mxu1 %v4638_v24  ;;  %4252 = vmatpush3.bf16.msra.mxu0 %v4639_v15  ;;  %v5843_v24 = vpop.eup %4979  ;;  %v738_v23 = vpack.c.bf16 %v5826_v31, %v5837_v41  ;;  %v670_v15 = vmul.f32 1.442695, %v547_v3  ;;  %v598_v56 = vmul.f32 1.442695, %v511_v59  ;;  %v4798_v31 = vld [vmem:[%s6572_s2 + $0x7e8] sm:$0xff]   ;;  %v4799_v41 = vld [vmem:[%s6572_s2 + $0x718] sm:$0xff]  }
  0xc9   : > { %4253 = vmatprep.subr.bf16.mxu0 %v4641_v36  ;;  %v4649_v36 = vld [vmem:[%s6572_s2 + $0x240] sm:$0xff]  }
  0xca   : > { %4993 = vpow2.f32 %v670_v15 }
  0xcb   : > { %4270 = vmatpush3.bf16.msra.mxu1 %v4640_v48  ;;  %v747_v48 = vpack.c.bf16 %v5832_v50, %v5843_v24  ;;  %4995 = vpow2.f32 %v598_v56  ;;  %v4833_v50 = vld [vmem:[%s6572_s2 + $0x850] sm:$0xff]   ;;  %v4832_v24 = vld [vmem:[%s6572_s2 + $0x8a8] sm:$0xff]  }
  0xcc   : > { %4271 = vmatprep.subr.bf16.mxu1 %v4642_v45  ;;  %4254 = vmatpush3.bf16.msra.mxu0 %v4643_v5  ;;  %v4650_v45 = vld [vmem:[%s6572_s2 + $0x2d0] sm:$0xff]   ;;  %v4982_v5 = vpop.eup %4981  ;;  %4997 = vpow2.f32 %v5681_v10  ;;  %v4672_v10 = vld [vmem:[%s6572_s2 + $0x3a8] sm:$0xff]  }
  0xcd   : > { %4255 = vmatprep.subr.bf16.mxu0 %v4645_v54  ;;  %v4984_v3 = vpop.eup %4983  ;;  %4999 = vpow2.f32 %v5684_v16  ;;  %v4674_v16 = vld [vmem:[%s6572_s2 + $0x3e0] sm:$0xff]  }
  0xce   : > { %v4986_v54 = vpop.eup %4985  ;;  %5001 = vpow2.f32 %v5694_v1  ;;  %v4675_v1 = vld [vmem:[%s6572_s2 + $0x310] sm:$0xff]  }
  0xcf   : > { %4272 = vmatpush3.bf16.msra.mxu1 %v4644_v28  ;;  %v4652_v28 = vld [vmem:[%s6572_s2 + $0x290] sm:$0xff]   ;;  %v4988_v59 = vpop.eup %4987  ;;  %v720_v15 = vpack.c.bf16 %v4984_v3, %v4986_v54  ;;  %5003 = vpow2.f32 %v5709_v17  ;;  %v4677_v17 = vld [vmem:[%s6572_s2 + $0x348] sm:$0xff]  }
  0xd0   : > { %4273 = vmatprep.subr.bf16.mxu1 %v4646_v58  ;;  %4256 = vmatpush3.bf16.msra.mxu0 %v4647_v43  ;;  %v4653_v58 = vld [vmem:[%s6572_s2 + $0x2c8] sm:$0xff]   ;;  %v4656_v43 = vld [vmem:[%s6572_s2 + $0x338] sm:$0xff]   ;;  %v725_v56 = vpack.c.bf16 %v4982_v5, %v4988_v59  ;;  %v4660_v3 = vld [vmem:[%s6572_s2 + $0x330] sm:$0xff]   ;;  %v5898_v54 = vpop.eup %4989 }
  0xd1   : > { %4257 = vmatprep.subr.bf16.mxu0 %v4649_v36  ;;  %v4655_v36 = vld [vmem:[%s6572_s2 + $0x288] sm:$0xff]   ;;  %v5903_v59 = vpop.eup %4991 }
  0xd2   : > { %v4661_v5 = vld [vmem:[%s6572_s2 + $0x368] sm:$0xff]  }
  0xd3   : > { %4274 = vmatpush3.bf16.msra.mxu1 %v4648_v52  ;;  %v4658_v52 = vld [vmem:[%s6572_s2 + $0x370] sm:$0xff]  }
  0xd4   : > { %4275 = vmatprep.subr.bf16.mxu1 %v4650_v45  ;;  %4258 = vmatpush3.bf16.msra.mxu0 %v4651_v9  ;;  %v4657_v45 = vld [vmem:[%s6572_s2 + $0x2c0] sm:$0xff]  }
  0xd5   : > { %4287 = vmatprep.subr.bf16.mxu0 %v4654_v30  ;;  %v4659_v9 = vld [vmem:[%s6572_s2 + $0x280] sm:$0xff]   ;;  %v387_v30 = vrot.slane %v5563_v49, %v5157_v27  ;;  %v4664_v27 = vld [vmem:[%s6572_s2 + $0x3b8] sm:$0xff]  }
  0xd7   : > { %4276 = vmatpush3.bf16.msra.mxu1 %v4652_v28  ;;  %3256 = vmatmul.mubr.bf16.vlgmr.msra.gmra.mxu0 %v720_v15  ;;  %v4662_v28 = vld [vmem:[%s6572_s2 + $0x3f8] sm:$0xff]   ;;  %v4994_v49 = vpop.eup %4993  ;;  %v4665_v15 = vld [vmem:[%s6572_s2 + $0x360] sm:$0xff]  }
  0xd8   : > { %4277 = vmatprep.subr.bf16.mxu1 %v4653_v58  ;;  %4288 = vmatpush3.bf16.msra.mxu0 %v4656_v43  ;;  %v4663_v58 = vld [vmem:[%s6572_s2 + $0x328] sm:$0xff]   ;;  %v549_v43 = vmul.f32 %v387_v30, %v5662_v33  ;;  %v4667_v33 = vld [vmem:[%s6572_s2 + $0x320] sm:$0xff]  }
  0xd9   : > { %3337 = vmatprep.mubr.bf16.mxu0 %v725_v56  ;;  %4289 = vmatprep.subr.bf16.mxu0 %v4658_v52  ;;  %v513_v52 = vmul.f32 %v387_v30, %v5678_v47  ;;  %v739_v56 = vpack.c.bf16 %v5898_v54, %v5903_v59  ;;  %v4668_v47 = vld [vmem:[%s6572_s2 + $0x3b0] sm:$0xff]   ;;  %v4768_v54 = vld [vmem:[%s6572_s2 + $0x6a8] sm:$0xff]   ;;  %v4770_v59 = vld [vmem:[%s6572_s2 + $0x6e0] sm:$0xff]  }
  0xda   : > { %v674_v30 = vmul.f32 1.442695, %v549_v43  ;;  %v4679_v43 = vld [vmem:[%s6572_s2 + $0x308] sm:$0xff]  }
  0xdb   : > { %4278 = vmatpush3.bf16.msra.mxu1 %v4655_v36  ;;  %v4666_v36 = vld [vmem:[%s6572_s2 + $0x3f0] sm:$0xff]  }
  0xdc   : > { %4279 = vmatprep.subr.bf16.mxu1 %v4657_v45  ;;  %4290 = vmatpush3.bf16.msra.mxu0 %v4660_v3  ;;  %v4996_v45 = vpop.eup %4995  ;;  %5005 = vpow2.f32 %v674_v30 }
  0xdd   : > { %4291 = vmatprep.subr.bf16.mxu0 %v4661_v5  ;;  %v727_v3 = vpack.c.bf16 %v4994_v49, %v4996_v45  ;;  %v6583_v5 = vpack.c.bf16 %v5472_v32, %v5477_v8  ;;  %v4671_v32 = vld [vmem:[%s6572_s2 + $0x318] sm:$0xff]   ;;  %v4673_v8 = vld [vmem:[%s6572_s2 + $0x350] sm:$0xff]  }
  0xde   : > { %v4678_v49 = vld [vmem:[%s6572_s2 + $0x3d8] sm:$0xff]  }
  0xdf   : > { %4280 = vmatpush3.bf16.msra.mxu1 %v4659_v9  ;;  %v4669_v9 = vld [vmem:[%s6572_s2 + $0x358] sm:$0xff]  }
  0xe0   : > { %4309 = vmatprep.subr.bf16.mxu1 %v4662_v28  ;;  %4292 = vmatpush3.bf16.msra.mxu0 %v4663_v58  ;;  %v602_v28 = vmul.f32 1.442695, %v513_v52  ;;  %v4670_v58 = vld [vmem:[%s6572_s2 + $0x3e8] sm:$0xff]   ;;  %v5970_v52 = vpop.eup %4997 }
  0xe1   : > { %4293 = vmatprep.subr.bf16.mxu0 %v4665_v15  ;;  %v4681_v15 = vld [vmem:[%s6572_s2 + $0x340] sm:$0xff]   ;;  %v5975_v45 = vpop.eup %4999 }
  0xe2   : > { %3297 = vmatmul.mubr.bf16.vlgmr.msra.gmra.mxu1 %v6583_v5  ;;  %5007 = vpow2.f32 %v602_v28  ;;  %v4684_v5 = vld [vmem:[%s6572_s2 + $0x390] sm:$0xff]  }
  0xe3   : > { %4310 = vmatpush3.bf16.msra.mxu1 %v4664_v27  ;;  %3378 = vmatprep.mubr.bf16.mxu1 %v727_v3  ;;  %v4676_v27 = vld [vmem:[%s6572_s2 + $0x3a0] sm:$0xff]   ;;  %5009 = vpow2.f32 %v5689_v14  ;;  %v5981_v3 = vpop.eup %5001  ;;  %v4686_v14 = vld [vmem:[%s6572_s2 + $0x478] sm:$0xff]  }
  0xe4   : > { %4311 = vmatprep.subr.bf16.mxu1 %v4666_v36  ;;  %4294 = vmatpush3.bf16.msra.mxu0 %v4667_v33  ;;  %v4680_v36 = vld [vmem:[%s6572_s2 + $0x398] sm:$0xff]   ;;  %v4682_v33 = vld [vmem:[%s6572_s2 + $0x3d0] sm:$0xff]   ;;  %5011 = vpow2.f32 %v5701_v63  ;;  %v4685_v63 = vld [vmem:[%s6572_s2 + $0x3c8] sm:$0xff]  }
  0xe5   : > { %4295 = vmatprep.subr.bf16.mxu0 %v4669_v9  ;;  %v5987_v9 = vpop.eup %5003 }
  0xe7   : > { %4312 = vmatpush3.bf16.msra.mxu1 %v4668_v47  ;;  %v4683_v47 = vld [vmem:[%s6572_s2 + $0x300] sm:$0xff]  }
  0xe8   : > { %4313 = vmatprep.subr.bf16.mxu1 %v4670_v58  ;;  %4296 = vmatpush3.bf16.msra.mxu0 %v4671_v32  ;;  %v4688_v58 = vld [vmem:[%s6572_s2 + $0x438] sm:$0xff]   ;;  %v4690_v32 = vld [vmem:[%s6572_s2 + $0x470] sm:$0xff]  }
  0xe9   : > { %4297 = vmatprep.subr.bf16.mxu0 %v4673_v8  ;;  %v5006_v30 = vpop.eup %5005  ;;  %v4687_v8 = vld [vmem:[%s6572_s2 + $0x388] sm:$0xff]  }
  0xeb   : > { %4314 = vmatpush3.bf16.msra.mxu1 %v4672_v10 }
  0xec   : > { %4315 = vmatprep.subr.bf16.mxu1 %v4674_v16  ;;  %4298 = vmatpush3.bf16.msra.mxu0 %v4675_v1  ;;  %v741_v16 = vpack.c.bf16 %v5987_v9, %v5981_v3  ;;  %v740_v1 = vpack.c.bf16 %v5970_v52, %v5975_v45  ;;  %v4791_v3 = vld [vmem:[%s6572_s2 + $0x728] sm:$0xff]   ;;  %v4793_v9 = vld [vmem:[%s6572_s2 + $0x760] sm:$0xff]  }
  0xed   : > { %4299 = vmatprep.subr.bf16.mxu0 %v4677_v17  ;;  %v6584_v17 = vpack.c.bf16 %v5521_v6, %v5519_v13  ;;  %v4691_v13 = vld [vmem:[%s6572_s2 + $0x380] sm:$0xff]   ;;  %v4694_v6 = vld [vmem:[%s6572_s2 + $0x4f8] sm:$0xff]   ;;  %v4821_v52 = vld [vmem:[%s6572_s2 + $0x868] sm:$0xff]  }
  0xee   : > { %v4819_v45 = vld [vmem:[%s6572_s2 + $0x780] sm:$0xff]  }
  0xef   : > { %4316 = vmatpush3.bf16.msra.mxu1 %v4676_v27  ;;  %v5008_v28 = vpop.eup %5007  ;;  %v4689_v27 = vld [vmem:[%s6572_s2 + $0x3c0] sm:$0xff]  }
  0xf0   : > { %4317 = vmatprep.subr.bf16.mxu1 %v4678_v49  ;;  %4300 = vmatpush3.bf16.msra.mxu0 %v4679_v43  ;;  %v729_v10 = vpack.c.bf16 %v5006_v30, %v5008_v28  ;;  %v4692_v49 = vld [vmem:[%s6572_s2 + $0x430] sm:$0xff]   ;;  %v4693_v43 = vld [vmem:[%s6572_s2 + $0x468] sm:$0xff]  }
  0xf1   : > { %4301 = vmatprep.subr.bf16.mxu0 %v4681_v15  ;;  %v6029_v15 = vpop.eup %5009  ;;  %v4698_v30 = vld [vmem:[%s6572_s2 + $0x4f0] sm:$0xff]  }
  0xf3   : > { %4318 = vmatpush3.bf16.msra.mxu1 %v4680_v36  ;;  %v4695_v36 = vld [vmem:[%s6572_s2 + $0x428] sm:$0xff]  }
  0xf4   : > { %4319 = vmatprep.subr.bf16.mxu1 %v4682_v33  ;;  %4302 = vmatpush3.bf16.msra.mxu0 %v4683_v47  ;;  %v6034_v33 = vpop.eup %5011  ;;  %v4697_v47 = vld [vmem:[%s6572_s2 + $0x460] sm:$0xff]  }
  0xf5   : > { %4331 = vmatprep.subr.bf16.mxu0 %v4686_v14  ;;  %v4696_v14 = vld [vmem:[%s6572_s2 + $0x4b8] sm:$0xff]   ;;  %v742_v28 = vpack.c.bf16 %v6034_v33, %v6029_v15  ;;  %v4830_v15 = vld [vmem:[%s6572_s2 + $0x8e8] sm:$0xff]  }
  0xf6   : > { %v4831_v33 = vld [vmem:[%s6572_s2 + $0x818] sm:$0xff]  }
  0xf7   : > { %4320 = vmatpush3.bf16.msra.mxu1 %v4684_v5  ;;  %3338 = vmatmul.mubr.bf16.vlgmr.msra.gmra.mxu0 %v6584_v17  ;;  %v4699_v5 = vld [vmem:[%s6572_s2 + $0x420] sm:$0xff]   ;;  %v4705_v17 = vld [vmem:[%s6572_s2 + $0x450] sm:$0xff]  }
  0xf8   : > { %4321 = vmatprep.subr.bf16.mxu1 %v4685_v63  ;;  %4332 = vmatpush3.bf16.msra.mxu0 %v4688_v58  ;;  %v6585_v63 = vpack.c.bf16 %v5664_v61, %v5686_v29  ;;  %v4701_v58 = vld [vmem:[%s6572_s2 + $0x458] sm:$0xff]   ;;  %v4702_v61 = vld [vmem:[%s6572_s2 + $0x4e8] sm:$0xff]  }
  0xf9   : > { %3419 = vmatprep.mubr.bf16.mxu0 %v729_v10  ;;  %4333 = vmatprep.subr.bf16.mxu0 %v4690_v32  ;;  %v4700_v32 = vld [vmem:[%s6572_s2 + $0x4b0] sm:$0xff]   ;;  %v4703_v29 = vld [vmem:[%s6572_s2 + $0x418] sm:$0xff]  }
  0xfb   : > { %4322 = vmatpush3.bf16.msra.mxu1 %v4687_v8  ;;  %v6586_v8 = vld [vmem:[#allocation3_spill] sm:$0xff] }
  0xfc   : > { %4323 = vmatprep.subr.bf16.mxu1 %v4689_v27  ;;  %4334 = vmatpush3.bf16.msra.mxu0 %v4692_v49  ;;  %v6587_v10 = vpack.c.bf16 %v5584_v7, %v6586_v8  ;;  %v4704_v7 = vld [vmem:[%s6572_s2 + $0x4a8] sm:$0xff]   ;;  %v4706_v27 = vld [vmem:[%s6572_s2 + $0x4e0] sm:$0xff]   ;;  %v4707_v49 = vld [vmem:[%s6572_s2 + $0x410] sm:$0xff]  }
  0xfd   : > { %4335 = vmatprep.subr.bf16.mxu0 %v4693_v43  ;;  %v4709_v43 = vld [vmem:[%s6572_s2 + $0x448] sm:$0xff]   ;;  %v4720_v8 = vld [vmem:[%s6572_s2 + $0x538] sm:$0xff]  }
  0xff   : > { %4324 = vmatpush3.bf16.msra.mxu1 %v4691_v13  ;;  %v4708_v13 = vld [vmem:[%s6572_s2 + $0x4a0] sm:$0xff]  }
 0x100   : > { %4353 = vmatprep.subr.bf16.mxu1 %v4694_v6  ;;  %4336 = vmatpush3.bf16.msra.mxu0 %v4695_v36  ;;  %v4710_v6 = vld [vmem:[%s6572_s2 + $0x4d8] sm:$0xff]   ;;  %v4711_v36 = vld [vmem:[%s6572_s2 + $0x408] sm:$0xff]  }
 0x101   : > { %4337 = vmatprep.subr.bf16.mxu0 %v4697_v47  ;;  %v4713_v47 = vld [vmem:[%s6572_s2 + $0x440] sm:$0xff]  }
 0x102   : > { %3379 = vmatmul.mubr.bf16.vlgmr.msra.gmra.mxu1 %v6585_v63  ;;  %v4718_v63 = vld [vmem:[%s6572_s2 + $0x578] sm:$0xff]  }
 0x103   : > { %4354 = vmatpush3.bf16.msra.mxu1 %v4696_v14  ;;  %3460 = vmatprep.mubr.bf16.mxu1 %v6587_v10  ;;  %v4712_v14 = vld [vmem:[%s6572_s2 + $0x498] sm:$0xff]   ;;  %v4722_v10 = vld [vmem:[%s6572_s2 + $0x570] sm:$0xff]  }
 0x104   : > { %4355 = vmatprep.subr.bf16.mxu1 %v4698_v30  ;;  %4338 = vmatpush3.bf16.msra.mxu0 %v4699_v5  ;;  %v4714_v30 = vld [vmem:[%s6572_s2 + $0x4d0] sm:$0xff]   ;;  %v4715_v5 = vld [vmem:[%s6572_s2 + $0x400] sm:$0xff]  }
 0x105   : > { %4339 = vmatprep.subr.bf16.mxu0 %v4701_v58  ;;  %v4716_v58 = vld [vmem:[%s6572_s2 + $0x490] sm:$0xff]  }
 0x107   : > { %4356 = vmatpush3.bf16.msra.mxu1 %v4700_v32  ;;  %v4717_v32 = vld [vmem:[%s6572_s2 + $0x4c8] sm:$0xff]  }
 0x108   : > { %4357 = vmatprep.subr.bf16.mxu1 %v4702_v61  ;;  %4340 = vmatpush3.bf16.msra.mxu0 %v4703_v29  ;;  %v4719_v61 = vld [vmem:[%s6572_s2 + $0x488] sm:$0xff]   ;;  %v4721_v29 = vld [vmem:[%s6572_s2 + $0x4c0] sm:$0xff]  }
 0x109   : > { %4341 = vmatprep.subr.bf16.mxu0 %v4705_v17  ;;  %v4724_v17 = vld [vmem:[%s6572_s2 + $0x530] sm:$0xff]  }
 0x10b   : > { %4358 = vmatpush3.bf16.msra.mxu1 %v4704_v7  ;;  %v6588_v7 = vpack.c.bf16 %v5622_v44, %v5611_v0  ;;  %v4727_v0 = vld [vmem:[%s6572_s2 + $0x528] sm:$0xff]   ;;  %v4729_v44 = vld [vmem:[%s6572_s2 + $0x560] sm:$0xff]  }
 0x10c   : > { %4359 = vmatprep.subr.bf16.mxu1 %v4706_v27  ;;  %4342 = vmatpush3.bf16.msra.mxu0 %v4707_v49  ;;  %v4728_v27 = vld [vmem:[%s6572_s2 + $0x5b8] sm:$0xff]   ;;  %v4730_v49 = vld [vmem:[%s6572_s2 + $0x5f0] sm:$0xff]  }
 0x10d   : > { %4343 = vmatprep.subr.bf16.mxu0 %v4709_v43  ;;  %v4731_v43 = vld [vmem:[%s6572_s2 + $0x520] sm:$0xff]  }
 0x10f   : > { %4360 = vmatpush3.bf16.msra.mxu1 %v4708_v13  ;;  %v6589_v13 = vld [vmem:[#allocation2_spill] sm:$0xff] }
 0x110   : > { %4361 = vmatprep.subr.bf16.mxu1 %v4710_v6  ;;  %4344 = vmatpush3.bf16.msra.mxu0 %v4711_v36  ;;  %v6590_v6 = vld [vmem:[#allocation4_spill] sm:$0xff] }
 0x111   : > { %4345 = vmatprep.subr.bf16.mxu0 %v4713_v47  ;;  %v6591_v36 = vpack.c.bf16 %v6589_v13, %v6590_v6  ;;  %v4733_v47 = vld [vmem:[%s6572_s2 + $0x558] sm:$0xff]   ;;  %v6593_v13 = vpack.c.bf16 %v5630_v53, %v5618_v19  ;;  %v4753_v6 = vld [vmem:[%s6572_s2 + $0x5c0] sm:$0xff]   ;;  %v4757_v19 = vld [vmem:[%s6572_s2 + $0x668] sm:$0xff]  }
 0x112   : > { %v4755_v53 = vld [vmem:[%s6572_s2 + $0x580] sm:$0xff]  }
 0x113   : > { %4362 = vmatpush3.bf16.msra.mxu1 %v4712_v14  ;;  %v6592_v14 = vpack.c.bf16 %v5672_v39, %v5691_v38  ;;  %v4737_v39 = vld [vmem:[%s6572_s2 + $0x550] sm:$0xff]   ;;  %v4736_v38 = vld [vmem:[%s6572_s2 + $0x5a8] sm:$0xff]  }
 0x114   : > { %4363 = vmatprep.subr.bf16.mxu1 %v4714_v30  ;;  %4346 = vmatpush3.bf16.msra.mxu0 %v4715_v5  ;;  %v4732_v30 = vld [vmem:[%s6572_s2 + $0x5b0] sm:$0xff]   ;;  %v4734_v5 = vld [vmem:[%s6572_s2 + $0x5e8] sm:$0xff]  }
 0x115   : > { %4375 = vmatprep.subr.bf16.mxu0 %v4718_v63  ;;  %v4735_v63 = vld [vmem:[%s6572_s2 + $0x518] sm:$0xff]  }
 0x117   : > { %4364 = vmatpush3.bf16.msra.mxu1 %v4716_v58  ;;  %3420 = vmatmul.mubr.bf16.vlgmr.msra.gmra.mxu0 %v728_v42  ;;  %v4726_v42 = vld [vmem:[%s6572_s2 + $0x5f8] sm:$0xff]   ;;  %v4738_v58 = vld [vmem:[%s6572_s2 + $0x5e0] sm:$0xff]  }
 0x118   : > { %4365 = vmatprep.subr.bf16.mxu1 %v4717_v32  ;;  %4376 = vmatpush3.bf16.msra.mxu0 %v4720_v8  ;;  %v4739_v32 = vld [vmem:[%s6572_s2 + $0x510] sm:$0xff]   ;;  %v4741_v8 = vld [vmem:[%s6572_s2 + $0x548] sm:$0xff]  }
 0x119   : > { %3501 = vmatprep.mubr.bf16.mxu0 %v6588_v7  ;;  %4377 = vmatprep.subr.bf16.mxu0 %v4722_v10  ;;  %v4740_v10 = vld [vmem:[%s6572_s2 + $0x5a0] sm:$0xff]   ;;  %v4744_v7 = vld [vmem:[%s6572_s2 + $0x598] sm:$0xff]  }
 0x11b   : > { %4366 = vmatpush3.bf16.msra.mxu1 %v4719_v61  ;;  %v4742_v61 = vld [vmem:[%s6572_s2 + $0x5d8] sm:$0xff]  }
 0x11c   : > { %4367 = vmatprep.subr.bf16.mxu1 %v4721_v29  ;;  %4378 = vmatpush3.bf16.msra.mxu0 %v4724_v17  ;;  %v4743_v29 = vld [vmem:[%s6572_s2 + $0x508] sm:$0xff]   ;;  %v4745_v17 = vld [vmem:[%s6572_s2 + $0x540] sm:$0xff]  }
 0x11d   : > { %4379 = vmatprep.subr.bf16.mxu0 %v4725_v55  ;;  %v4746_v55 = vld [vmem:[%s6572_s2 + $0x5d0] sm:$0xff]  }
 0x11f   : > { %4368 = vmatpush3.bf16.msra.mxu1 %v4723_v20  ;;  %v4747_v20 = vld [vmem:[%s6572_s2 + $0x500] sm:$0xff]  }
 0x120   : > { %4397 = vmatprep.subr.bf16.mxu1 %v4726_v42  ;;  %4380 = vmatpush3.bf16.msra.mxu0 %v4727_v0  ;;  %v4750_v42 = vld [vmem:[%s6572_s2 + $0x678] sm:$0xff]   ;;  %v4748_v0 = vld [vmem:[%s6572_s2 + $0x590] sm:$0xff]  }
 0x121   : > { %4381 = vmatprep.subr.bf16.mxu0 %v4729_v44  ;;  %v4749_v44 = vld [vmem:[%s6572_s2 + $0x5c8] sm:$0xff]  }
 0x122   : > { %3461 = vmatmul.mubr.bf16.vlgmr.msra.gmra.mxu1 %v6591_v36  ;;  %v4756_v36 = vld [vmem:[%s6572_s2 + $0x630] sm:$0xff]  }
 0x123   : > { %4398 = vmatpush3.bf16.msra.mxu1 %v4728_v27  ;;  %3542 = vmatprep.mubr.bf16.mxu1 %v6592_v14  ;;  %v4752_v27 = vld [vmem:[%s6572_s2 + $0x638] sm:$0xff]   ;;  %v4762_v14 = vld [vmem:[%s6572_s2 + $0x6f0] sm:$0xff]  }
 0x124   : > { %4399 = vmatprep.subr.bf16.mxu1 %v4730_v49  ;;  %4382 = vmatpush3.bf16.msra.mxu0 %v4731_v43  ;;  %v4754_v49 = vld [vmem:[%s6572_s2 + $0x670] sm:$0xff]   ;;  %v4751_v43 = vld [vmem:[%s6572_s2 + $0x588] sm:$0xff]  }
 0x125   : > { %4383 = vmatprep.subr.bf16.mxu0 %v4733_v47  ;;  %v4760_v47 = vld [vmem:[%s6572_s2 + $0x6b8] sm:$0xff]  }
 0x127   : > { %4400 = vmatpush3.bf16.msra.mxu1 %v4732_v30  ;;  %v4763_v30 = vld [vmem:[%s6572_s2 + $0x620] sm:$0xff]  }
 0x128   : > { %4401 = vmatprep.subr.bf16.mxu1 %v4734_v5  ;;  %4384 = vmatpush3.bf16.msra.mxu0 %v4735_v63  ;;  %v6594_v5 = vpack.c.bf16 %v5634_v62, %v5652_v4  ;;  %v4765_v63 = vld [vmem:[%s6572_s2 + $0x658] sm:$0xff]   ;;  %v4766_v62 = vld [vmem:[%s6572_s2 + $0x6e8] sm:$0xff]  }
 0x129   : > { %4385 = vmatprep.subr.bf16.mxu0 %v4737_v39  ;;  %v4764_v39 = vld [vmem:[%s6572_s2 + $0x6b0] sm:$0xff]   ;;  %v4767_v4 = vld [vmem:[%s6572_s2 + $0x618] sm:$0xff]  }
 0x12b   : > { %4402 = vmatpush3.bf16.msra.mxu1 %v4736_v38  ;;  %v4769_v38 = vld [vmem:[%s6572_s2 + $0x650] sm:$0xff]  }
 0x12c   : > { %4403 = vmatprep.subr.bf16.mxu1 %v4738_v58  ;;  %4386 = vmatpush3.bf16.msra.mxu0 %v4739_v32  ;;  %v4773_v58 = vld [vmem:[%s6572_s2 + $0x648] sm:$0xff]   ;;  %v4772_v32 = vld [vmem:[%s6572_s2 + $0x6a0] sm:$0xff]  }
 0x12d   : > { %4387 = vmatprep.subr.bf16.mxu0 %v4741_v8  ;;  %v4774_v8 = vld [vmem:[%s6572_s2 + $0x6d8] sm:$0xff]  }
 0x12f   : > { %4404 = vmatpush3.bf16.msra.mxu1 %v4740_v10  ;;  %v4775_v10 = vld [vmem:[%s6572_s2 + $0x608] sm:$0xff]  }
 0x130   : > { %4405 = vmatprep.subr.bf16.mxu1 %v4742_v61  ;;  %4388 = vmatpush3.bf16.msra.mxu0 %v4743_v29  ;;  %v4777_v61 = vld [vmem:[%s6572_s2 + $0x640] sm:$0xff]   ;;  %v4776_v29 = vld [vmem:[%s6572_s2 + $0x698] sm:$0xff]  }
 0x131   : > { %4389 = vmatprep.subr.bf16.mxu0 %v4745_v17  ;;  %v4778_v17 = vld [vmem:[%s6572_s2 + $0x6d0] sm:$0xff]  }
 0x133   : > { %4406 = vmatpush3.bf16.msra.mxu1 %v4744_v7  ;;  %v4779_v7 = vld [vmem:[%s6572_s2 + $0x600] sm:$0xff]  }
 0x134   : > { %4407 = vmatprep.subr.bf16.mxu1 %v4746_v55  ;;  %4390 = vmatpush3.bf16.msra.mxu0 %v4747_v20  ;;  %v4782_v55 = vld [vmem:[%s6572_s2 + $0x778] sm:$0xff]   ;;  %v4780_v20 = vld [vmem:[%s6572_s2 + $0x690] sm:$0xff]  }
 0x135   : > { %4419 = vmatprep.subr.bf16.mxu0 %v4750_v42  ;;  %v4781_v42 = vld [vmem:[%s6572_s2 + $0x6c8] sm:$0xff]  }
 0x137   : > { %4408 = vmatpush3.bf16.msra.mxu1 %v4748_v0  ;;  %3502 = vmatmul.mubr.bf16.vlgmr.msra.gmra.mxu0 %v6593_v13  ;;  %v4784_v0 = vld [vmem:[%s6572_s2 + $0x738] sm:$0xff]   ;;  %v4794_v13 = vld [vmem:[%s6572_s2 + $0x7f0] sm:$0xff]  }
 0x138   : > { %4409 = vmatprep.subr.bf16.mxu1 %v4749_v44  ;;  %4420 = vmatpush3.bf16.msra.mxu0 %v4752_v27  ;;  %v4786_v44 = vld [vmem:[%s6572_s2 + $0x770] sm:$0xff]   ;;  %v4783_v27 = vld [vmem:[%s6572_s2 + $0x688] sm:$0xff]  }
 0x139   : > { %3583 = vmatprep.mubr.bf16.mxu0 %v737_v37  ;;  %4421 = vmatprep.subr.bf16.mxu0 %v4754_v49  ;;  %v4761_v37 = vld [vmem:[%s6572_s2 + $0x660] sm:$0xff]  }
 0x13a   : > { %v4785_v49 = vld [vmem:[%s6572_s2 + $0x6c0] sm:$0xff]  }
 0x13b   : > { %4410 = vmatpush3.bf16.msra.mxu1 %v4751_v43  ;;  %v4788_v43 = vld [vmem:[%s6572_s2 + $0x730] sm:$0xff]  }
 0x13c   : > { %4411 = vmatprep.subr.bf16.mxu1 %v4753_v6  ;;  %4422 = vmatpush3.bf16.msra.mxu0 %v4756_v36  ;;  %v4795_v6 = vld [vmem:[%s6572_s2 + $0x720] sm:$0xff]   ;;  %v4797_v36 = vld [vmem:[%s6572_s2 + $0x758] sm:$0xff]  }
 0x13d   : > { %4423 = vmatprep.subr.bf16.mxu0 %v4757_v19  ;;  %v6595_v19 = vpack.c.bf16 %v5636_v21, %v5658_v51  ;;  %v4801_v21 = vld [vmem:[%s6572_s2 + $0x750] sm:$0xff]   ;;  %v4800_v51 = vld [vmem:[%s6572_s2 + $0x7a8] sm:$0xff]  }
 0x13f   : > { %4412 = vmatpush3.bf16.msra.mxu1 %v4755_v53  ;;  %v4796_v53 = vld [vmem:[%s6572_s2 + $0x7b0] sm:$0xff]  }
 0x140   : > { %4441 = vmatprep.subr.bf16.mxu1 %v4758_v35  ;;  %4424 = vmatpush3.bf16.msra.mxu0 %v4759_v46  ;;  %v4803_v35 = vld [vmem:[%s6572_s2 + $0x710] sm:$0xff]   ;;  %v4805_v46 = vld [vmem:[%s6572_s2 + $0x748] sm:$0xff]  }
 0x141   : > { %4425 = vmatprep.subr.bf16.mxu0 %v4761_v37  ;;  %v4804_v37 = vld [vmem:[%s6572_s2 + $0x7a0] sm:$0xff]  }
 0x142   : > { %3543 = vmatmul.mubr.bf16.vlgmr.msra.gmra.mxu1 %v6594_v5  ;;  %v4808_v5 = vld [vmem:[%s6572_s2 + $0x798] sm:$0xff]  }
 0x143   : > { %4442 = vmatpush3.bf16.msra.mxu1 %v4760_v47  ;;  %3624 = vmatprep.mubr.bf16.mxu1 %v739_v56  ;;  %v4771_v56 = vld [vmem:[%s6572_s2 + $0x610] sm:$0xff]   ;;  %v4806_v47 = vld [vmem:[%s6572_s2 + $0x7d8] sm:$0xff]  }
 0x144   : > { %4443 = vmatprep.subr.bf16.mxu1 %v4762_v14  ;;  %4426 = vmatpush3.bf16.msra.mxu0 %v4763_v30  ;;  %v4807_v14 = vld [vmem:[%s6572_s2 + $0x708] sm:$0xff]   ;;  %v4809_v30 = vld [vmem:[%s6572_s2 + $0x740] sm:$0xff]  }
 0x145   : > { %4427 = vmatprep.subr.bf16.mxu0 %v4765_v63  ;;  %v4810_v63 = vld [vmem:[%s6572_s2 + $0x7d0] sm:$0xff]  }
 0x147   : > { %4444 = vmatpush3.bf16.msra.mxu1 %v4764_v39  ;;  %v4811_v39 = vld [vmem:[%s6572_s2 + $0x700] sm:$0xff]  }
 0x148   : > { %4445 = vmatprep.subr.bf16.mxu1 %v4766_v62  ;;  %4428 = vmatpush3.bf16.msra.mxu0 %v4767_v4  ;;  %v4814_v62 = vld [vmem:[%s6572_s2 + $0x878] sm:$0xff]   ;;  %v4812_v4 = vld [vmem:[%s6572_s2 + $0x790] sm:$0xff]  }
 0x149   : > { %4429 = vmatprep.subr.bf16.mxu0 %v4769_v38  ;;  %v4813_v38 = vld [vmem:[%s6572_s2 + $0x7c8] sm:$0xff]  }
 0x14b   : > { %4446 = vmatpush3.bf16.msra.mxu1 %v4768_v54  ;;  %v4816_v54 = vld [vmem:[%s6572_s2 + $0x838] sm:$0xff]  }
 0x14c   : > { %4447 = vmatprep.subr.bf16.mxu1 %v4770_v59  ;;  %4430 = vmatpush3.bf16.msra.mxu0 %v4771_v56  ;;  %v4818_v59 = vld [vmem:[%s6572_s2 + $0x870] sm:$0xff]   ;;  %v4815_v56 = vld [vmem:[%s6572_s2 + $0x788] sm:$0xff]  }
 0x14d   : > { %4431 = vmatprep.subr.bf16.mxu0 %v4773_v58  ;;  %v4817_v58 = vld [vmem:[%s6572_s2 + $0x7c0] sm:$0xff]  }
 0x14f   : > { %4448 = vmatpush3.bf16.msra.mxu1 %v4772_v32  ;;  %v4820_v32 = vld [vmem:[%s6572_s2 + $0x830] sm:$0xff]  }
 0x150   : > { %4449 = vmatprep.subr.bf16.mxu1 %v4774_v8  ;;  %4432 = vmatpush3.bf16.msra.mxu0 %v4775_v10  ;;  %v4826_v8 = vld [vmem:[%s6572_s2 + $0x8f0] sm:$0xff]   ;;  %v4827_v10 = vld [vmem:[%s6572_s2 + $0x820] sm:$0xff]  }
 0x151   : > { %4433 = vmatprep.subr.bf16.mxu0 %v4777_v61  ;;  %v4829_v61 = vld [vmem:[%s6572_s2 + $0x858] sm:$0xff]  }
 0x153   : > { %4450 = vmatpush3.bf16.msra.mxu1 %v4776_v29  ;;  %v4828_v29 = vld [vmem:[%s6572_s2 + $0x8b0] sm:$0xff]  }
 0x154   : > { %4451 = vmatprep.subr.bf16.mxu1 %v4778_v17  ;;  %4434 = vmatpush3.bf16.msra.mxu0 %v4779_v7  ;;  %v4837_v17 = vld [vmem:[%s6572_s2 + $0x848] sm:$0xff]   ;;  %v4836_v7 = vld [vmem:[%s6572_s2 + $0x8a0] sm:$0xff]  }
 0x155   : > { %4463 = vmatprep.subr.bf16.mxu0 %v4782_v55  ;;  %v4838_v55 = vld [vmem:[%s6572_s2 + $0x8d8] sm:$0xff]  }
 0x157   : > { %4452 = vmatpush3.bf16.msra.mxu1 %v4780_v20  ;;  %3584 = vmatmul.mubr.bf16.vlgmr.msra.gmra.mxu0 %v736_v26  ;;  %v4790_v26 = vld [vmem:[%s6572_s2 + $0x7f8] sm:$0xff]   ;;  %v4839_v20 = vld [vmem:[%s6572_s2 + $0x808] sm:$0xff]  }
 0x158   : > { %4453 = vmatprep.subr.bf16.mxu1 %v4781_v42  ;;  %4464 = vmatpush3.bf16.msra.mxu0 %v4784_v0  ;;  %v4841_v42 = vld [vmem:[%s6572_s2 + $0x840] sm:$0xff]   ;;  %v4840_v0 = vld [vmem:[%s6572_s2 + $0x898] sm:$0xff]  }
 0x159   : > { %3665 = vmatprep.mubr.bf16.mxu0 %v741_v16  ;;  %4465 = vmatprep.subr.bf16.mxu0 %v4786_v44  ;;  %v4792_v16 = vld [vmem:[%s6572_s2 + $0x7b8] sm:$0xff]   ;;  %v4842_v44 = vld [vmem:[%s6572_s2 + $0x8d0] sm:$0xff]  }
 0x15b   : > { %4454 = vmatpush3.bf16.msra.mxu1 %v4783_v27  ;;  %v4843_v27 = vld [vmem:[%s6572_s2 + $0x800] sm:$0xff]  }
 0x15c   : > { %4455 = vmatprep.subr.bf16.mxu1 %v4785_v49  ;;  %4466 = vmatpush3.bf16.msra.mxu0 %v4788_v43  ;;  %v4844_v49 = vld [vmem:[%s6572_s2 + $0x890] sm:$0xff]   ;;  %v4845_v43 = vld [vmem:[%s6572_s2 + $0x8c8] sm:$0xff]  }
 0x15d   : > { %4467 = vmatprep.subr.bf16.mxu0 %v4789_v11  ;;  %v4846_v11 = vld [vmem:[%s6572_s2 + $0x888] sm:$0xff]  }
 0x15f   : > { %4456 = vmatpush3.bf16.msra.mxu1 %v4787_v2  ;;  %v6596_v2 = vpack.c.bf16 %v5698_v25, %v5706_v60  ;;  %v4193_v60 = vpop.f32.mrf.mxu1 }
 0x160   : > { %4485 = vmatprep.subr.bf16.mxu1 %v4790_v26  ;;  %4468 = vmatpush3.bf16.msra.mxu0 %v4791_v3  ;;  %v4847_v26 = vld [vmem:[%s6572_s2 + $0x8c0] sm:$0xff]  }
 0x161   : > { %4469 = vmatprep.subr.bf16.mxu0 %v4793_v9  ;;  %v4848_v3 = vld [vmem:[%s6572_s2 + $0x880] sm:$0xff]   ;;  %v4171_v9 = vpop.f32.mrf.mxu0 }
 0x162   : > { %3625 = vmatmul.mubr.bf16.vlgmr.msra.gmra.mxu1 %v738_v23  ;;  %v4802_v23 = vld [vmem:[%s6572_s2 + $0x7e0] sm:$0xff]  }
 0x163   : > { %4486 = vmatpush3.bf16.msra.mxu1 %v4792_v16  ;;  %3706 = vmatprep.mubr.bf16.mxu1 %v6595_v19  ;;  %v4172_v16 = vpop.f32.mrf.mxu0 }
 0x164   : > { %4487 = vmatprep.subr.bf16.mxu1 %v4794_v13  ;;  %4470 = vmatpush3.bf16.msra.mxu0 %v4795_v6  ;;  %v4194_v6 = vpop.f32.mrf.mxu1 }
 0x165   : > { %4471 = vmatprep.subr.bf16.mxu0 %v4797_v36  ;;  %v4174_v25 = vpop.f32.mrf.mxu0 }
 0x166   : > { %v4196_v19 = vpop.f32.mrf.mxu1 }
 0x167   : > { %4488 = vmatpush3.bf16.msra.mxu1 %v4796_v53  ;;  %v4175_v13 = vpop.f32.mrf.mxu0 }
 0x168   : > { %4489 = vmatprep.subr.bf16.mxu1 %v4798_v31  ;;  %4472 = vmatpush3.bf16.msra.mxu0 %v4799_v41  ;;  %v4197_v31 = vpop.f32.mrf.mxu1 }
 0x169   : > { %4473 = vmatprep.subr.bf16.mxu0 %v4801_v21 }
 0x16b   : > { %4490 = vmatpush3.bf16.msra.mxu1 %v4800_v51 }
 0x16c   : > { %4491 = vmatprep.subr.bf16.mxu1 %v4802_v23  ;;  %4474 = vmatpush3.bf16.msra.mxu0 %v4803_v35 }
 0x16d   : > { %4475 = vmatprep.subr.bf16.mxu0 %v4805_v46 }
 0x16f   : > { %4492 = vmatpush3.bf16.msra.mxu1 %v4804_v37 }
 0x170   : > { %4493 = vmatprep.subr.bf16.mxu1 %v4806_v47  ;;  %4476 = vmatpush3.bf16.msra.mxu0 %v4807_v14 }
 0x171   : > { %4477 = vmatprep.subr.bf16.mxu0 %v4809_v30 }
 0x173   : > { %4494 = vmatpush3.bf16.msra.mxu1 %v4808_v5 }
 0x174   : > { %4495 = vmatprep.subr.bf16.mxu1 %v4810_v63  ;;  %4478 = vmatpush3.bf16.msra.mxu0 %v4811_v39 }
 0x175   : > { %4507 = vmatprep.subr.bf16.mxu0 %v4814_v62 }
 0x176   : > { %v4215_v36 = vpop.f32.mrf.mxu0 }
 0x177   : > { %4496 = vmatpush3.bf16.msra.mxu1 %v4812_v4  ;;  %3666 = vmatmul.mubr.bf16.vlgmr.msra.gmra.mxu0 %v740_v1  ;;  %v4824_v1 = vld [vmem:[%s6572_s2 + $0x8b8] sm:$0xff]  }
 0x178   : > { %4497 = vmatprep.subr.bf16.mxu1 %v4813_v38  ;;  %4508 = vmatpush3.bf16.msra.mxu0 %v4816_v54  ;;  %v4216_v53 = vpop.f32.mrf.mxu0 }
 0x179   : > { %3747 = vmatprep.mubr.bf16.mxu0 %v745_v34  ;;  %4509 = vmatprep.subr.bf16.mxu0 %v4818_v59  ;;  %v4825_v34 = vld [vmem:[%s6572_s2 + $0x860] sm:$0xff]  }
 0x17a   : > { %v4218_v41 = vpop.f32.mrf.mxu0 }
 0x17b   : > { %4498 = vmatpush3.bf16.msra.mxu1 %v4815_v56 }
 0x17c   : > { %4499 = vmatprep.subr.bf16.mxu1 %v4817_v58  ;;  %4510 = vmatpush3.bf16.msra.mxu0 %v4820_v32  ;;  %v4219_v51 = vpop.f32.mrf.mxu0 }
 0x17d   : > { %4511 = vmatprep.subr.bf16.mxu0 %v4821_v52 }
 0x17f   : > { %4500 = vmatpush3.bf16.msra.mxu1 %v4819_v45 }
 0x180   : > { %4529 = vmatprep.subr.bf16.mxu1 %v4822_v12  ;;  %4512 = vmatpush3.bf16.msra.mxu0 %v4823_v18 }
 0x181   : > { %4513 = vmatprep.subr.bf16.mxu0 %v4825_v34 }
 0x182   : > { %3707 = vmatmul.mubr.bf16.vlgmr.msra.gmra.mxu1 %v742_v28  ;;  %v4835_v28 = vld [vmem:[%s6572_s2 + $0x810] sm:$0xff]   ;;  %v4237_v21 = vpop.f32.mrf.mxu1 }
 0x183   : > { %4530 = vmatpush3.bf16.msra.mxu1 %v4824_v1  ;;  %3788 = vmatprep.mubr.bf16.mxu1 %v747_v48  ;;  %v4834_v48 = vld [vmem:[%s6572_s2 + $0x8e0] sm:$0xff]  }
 0x184   : > { %4531 = vmatprep.subr.bf16.mxu1 %v4826_v8  ;;  %4514 = vmatpush3.bf16.msra.mxu0 %v4827_v10  ;;  %v4238_v23 = vpop.f32.mrf.mxu1 }
 0x185   : > { %4515 = vmatprep.subr.bf16.mxu0 %v4829_v61 }
 0x186   : > { %v4240_v46 = vpop.f32.mrf.mxu1 }
 0x187   : > { %4532 = vmatpush3.bf16.msra.mxu1 %v4828_v29 }
 0x188   : > { %4533 = vmatprep.subr.bf16.mxu1 %v4830_v15  ;;  %4516 = vmatpush3.bf16.msra.mxu0 %v4831_v33  ;;  %v4241_v47 = vpop.f32.mrf.mxu1 }
 0x189   : > { %4517 = vmatprep.subr.bf16.mxu0 %v4833_v50 }
 0x18b   : > { %4534 = vmatpush3.bf16.msra.mxu1 %v4832_v24  ;;  %v4173_v24 = vadd.f32 %v4172_v16, %v4171_v9  ;;  %v4220_v9 = vadd.f32 %v4219_v51, %v4218_v41 }
 0x18c   : > { %4535 = vmatprep.subr.bf16.mxu1 %v4834_v48  ;;  %4518 = vmatpush3.bf16.msra.mxu0 %v4835_v28  ;;  %v3864_v48 = vld [vmem:[%s6573_s3] ss:$0 sm:$0xff] }
 0x18d   : > { %4519 = vmatprep.subr.bf16.mxu0 %v4837_v17 }
 0x18f   : > { %4536 = vmatpush3.bf16.msra.mxu1 %v4836_v7  ;;  %v3094_v7 = vadd.f32 %v4173_v24, %v3864_v48 }
 0x190   : > { %4537 = vmatprep.subr.bf16.mxu1 %v4838_v55  ;;  %4520 = vmatpush3.bf16.msra.mxu0 %v4839_v20  ;;  %v4195_v55 = vadd.f32 %v4194_v6, %v4193_v60  ;;  %v4176_v20 = vadd.f32 %v4175_v13, %v4174_v25  ;;  %v4242_v13 = vadd.f32 %v4241_v47, %v4240_v46 }
 0x191   : > { %4521 = vmatprep.subr.bf16.mxu0 %v4841_v42 }
 0x193   : > { %4538 = vmatpush3.bf16.msra.mxu1 %v4840_v0 }
 0x194   : > { %4539 = vmatprep.subr.bf16.mxu1 %v4842_v44  ;;  %4522 = vmatpush3.bf16.msra.mxu0 %v4843_v27  ;;  %v4217_v44 = vadd.f32 %v4216_v53, %v4215_v36 }
 0x197   : > { %4540 = vmatpush3.bf16.msra.mxu1 %v4844_v49  ;;  %3748 = vmatmul.mubr.bf16.vlgmr.msra.gmra.mxu0 %v6596_v2  ;;  %v4259_v35 = vpop.f32.mrf.mxu0  ;;  %v3135_v49 = vadd.f32 %v4195_v55, %v3094_v7  ;;  %v4239_v2 = vadd.f32 %v4238_v23, %v4237_v21 }
 0x198   : > { %4541 = vmatprep.subr.bf16.mxu1 %v4845_v43  ;;  %v3097_v43 = vadd.f32 %v4176_v20, %v3864_v48 }
 0x199   : > { %v4260_v37 = vpop.f32.mrf.mxu0 }
 0x19a   : > { %v4261_v16 = vadd.f32 %v4260_v37, %v4259_v35 }
 0x19b   : > { %4542 = vmatpush3.bf16.msra.mxu1 %v4846_v11  ;;  %v4262_v22 = vpop.f32.mrf.mxu0  ;;  %v4198_v11 = vadd.f32 %v4197_v31, %v4196_v19 }
 0x19c   : > { %4543 = vmatprep.subr.bf16.mxu1 %v4847_v26 }
 0x19d   : > { %v3138_v6 = vadd.f32 %v4198_v11, %v3097_v43 }
 0x19f   : > { %4544 = vmatpush3.bf16.msra.mxu1 %v4848_v3  ;;  %v3176_v3 = vadd.f32 %v4217_v44, %v3135_v49  ;;  %v3179_v36 = vadd.f32 %v4220_v9, %v3138_v6 }
 0x1a1   : > { %v3217_v60 = vadd.f32 %v4239_v2, %v3176_v3  ;;  %v3220_v19 = vadd.f32 %v4242_v13, %v3179_v36 }
 0x1a2   : > { %3789 = vmatmul.mubr.bf16.vlgmr.msra.gmra.mxu1 %v746_v40  ;;  %v4281_v57 = vpop.f32.mrf.mxu1  ;;  %v4263_v40 = vpop.f32.mrf.mxu0 }
 0x1a3   : > { %v3258_v53 = vadd.f32 %v4261_v16, %v3217_v60  ;;  %v4264_v7 = vadd.f32 %v4263_v40, %v4262_v22 }
 0x1a4   : > { %v4282_v14 = vpop.f32.mrf.mxu1 }
 0x1a5   : > { %v4283_v25 = vadd.f32 %v4282_v14, %v4281_v57  ;;  %v3261_v44 = vadd.f32 %v4264_v7, %v3220_v19 }
 0x1a6   : > { %v4284_v5 = vpop.f32.mrf.mxu1 }
 0x1a7   : > { %v3299_v31 = vadd.f32 %v4283_v25, %v3258_v53 }
 0x1a8   : > { %v4285_v39 = vpop.f32.mrf.mxu1 }
 0x1a9   : > { %v4286_v21 = vadd.f32 %v4285_v39, %v4284_v5 }
 0x1ab   : > { %v3302_v43 = vadd.f32 %v4286_v21, %v3261_v44 }
 0x1b7   : > { %v4303_v30 = vpop.f32.mrf.mxu0 }
 0x1b9   : > { %v4304_v63 = vpop.f32.mrf.mxu0 }
 0x1ba   : > { %v4305_v55 = vadd.f32 %v4304_v63, %v4303_v30 }
 0x1bb   : > { %v4306_v62 = vpop.f32.mrf.mxu0 }
 0x1bc   : > { %v3340_v49 = vadd.f32 %v4305_v55, %v3299_v31 }
 0x1bd   : > { %v4307_v38 = vpop.f32.mrf.mxu0 }
 0x1be   : > { %v4308_v41 = vadd.f32 %v4307_v38, %v4306_v62 }
 0x1c0   : > { %v3343_v14 = vadd.f32 %v4308_v41, %v3302_v43 }
 0x1c2   : > { %v4325_v4 = vpop.f32.mrf.mxu1 }
 0x1c4   : > { %v4326_v54 = vpop.f32.mrf.mxu1 }
 0x1c5   : > { %v4327_v23 = vadd.f32 %v4326_v54, %v4325_v4 }
 0x1c6   : > { %v4328_v56 = vpop.f32.mrf.mxu1 }
 0x1c7   : > { %v3381_v11 = vadd.f32 %v4327_v23, %v3340_v49 }
 0x1c8   : > { %v4329_v32 = vpop.f32.mrf.mxu1 }
 0x1c9   : > { %v4330_v46 = vadd.f32 %v4329_v32, %v4328_v56 }
 0x1cb   : > { %v3384_v2 = vadd.f32 %v4330_v46, %v3343_v14 }
 0x1d7   : > { %v4347_v59 = vpop.f32.mrf.mxu0 }
 0x1d9   : > { %v4348_v58 = vpop.f32.mrf.mxu0 }
 0x1da   : > { %v4349_v51 = vadd.f32 %v4348_v58, %v4347_v59 }
 0x1db   : > { %v4350_v52 = vpop.f32.mrf.mxu0 }
 0x1dc   : > { %v3422_v22 = vadd.f32 %v4349_v51, %v3381_v11 }
 0x1dd   : > { %v4351_v12 = vpop.f32.mrf.mxu0 }
 0x1de   : > { %v4352_v40 = vadd.f32 %v4351_v12, %v4350_v52 }
 0x1e0   : > { %v3425_v62 = vadd.f32 %v4352_v40, %v3384_v2 }
 0x1e2   : > { %v4369_v45 = vpop.f32.mrf.mxu1 }
 0x1e4   : > { %v4370_v18 = vpop.f32.mrf.mxu1 }
 0x1e5   : > { %v4371_v47 = vadd.f32 %v4370_v18, %v4369_v45 }
 0x1e6   : > { %v4372_v1 = vpop.f32.mrf.mxu1 }
 0x1e7   : > { %v3463_v3 = vadd.f32 %v4371_v47, %v3422_v22 }
 0x1e8   : > { %v4373_v10 = vpop.f32.mrf.mxu1 }
 0x1e9   : > { %v4374_v5 = vadd.f32 %v4373_v10, %v4372_v1 }
 0x1eb   : > { %v3466_v56 = vadd.f32 %v4374_v5, %v3425_v62 }
 0x1f7   : > { %v4391_v34 = vpop.f32.mrf.mxu0 }
 0x1f9   : > { %v4392_v8 = vpop.f32.mrf.mxu0 }
 0x1fa   : > { %v4393_v30 = vadd.f32 %v4392_v8, %v4391_v34 }
 0x1fb   : > { %v6557_v61 = vpop.f32.mrf.mxu0 }
 0x1fc   : > { %6597 = vst [vmem:[#allocation3_spill] sm:$0xff] %v6557_v61  ;;  %v3504_v38 = vadd.f32 %v4393_v30, %v3463_v3 }
 0x1fd   : > { %v4395_v15 = vpop.f32.mrf.mxu0 }
 0x202   : > { %v4413_v29 = vpop.f32.mrf.mxu1 }
 0x203   : > { %v6598_v59 = vld [vmem:[#allocation3_spill] sm:$0xff] }
 0x204   : > { %v4414_v33 = vpop.f32.mrf.mxu1  ;;  %v4396_v58 = vadd.f32 %v4395_v15, %v6598_v59 }
 0x205   : > { %v4415_v39 = vadd.f32 %v4414_v33, %v4413_v29 }
 0x206   : > { %v4416_v28 = vpop.f32.mrf.mxu1  ;;  %v3507_v52 = vadd.f32 %v4396_v58, %v3466_v56 }
 0x207   : > { %v3545_v32 = vadd.f32 %v4415_v39, %v3504_v38 }
 0x208   : > { %v4417_v42 = vpop.f32.mrf.mxu1 }
 0x209   : > { %v4418_v45 = vadd.f32 %v4417_v42, %v4416_v28 }
 0x20b   : > { %v3548_v10 = vadd.f32 %v4418_v45, %v3507_v52 }
 0x217   : > { %v4435_v50 = vpop.f32.mrf.mxu0 }
 0x219   : > { %v4436_v17 = vpop.f32.mrf.mxu0 }
 0x21a   : > { %v4437_v9 = vadd.f32 %v4436_v17, %v4435_v50 }
 0x21b   : > { %v4438_v0 = vpop.f32.mrf.mxu0 }
 0x21c   : > { %v3586_v12 = vadd.f32 %v4437_v9, %v3545_v32 }
 0x21d   : > { %v4439_v26 = vpop.f32.mrf.mxu0 }
 0x21e   : > { %v4440_v34 = vadd.f32 %v4439_v26, %v4438_v0 }
 0x220   : > { %v3589_v25 = vadd.f32 %v4440_v34, %v3548_v10 }
 0x222   : > { %v4457_v27 = vpop.f32.mrf.mxu1 }
 0x224   : > { %v4458_v61 = vpop.f32.mrf.mxu1 }
 0x225   : > { %v4459_v18 = vadd.f32 %v4458_v61, %v4457_v27 }
 0x226   : > { %v4460_v20 = vpop.f32.mrf.mxu1 }
 0x227   : > { %v3627_v29 = vadd.f32 %v4459_v18, %v3586_v12 }
 0x228   : > { %v4461_v35 = vpop.f32.mrf.mxu1 }
 0x229   : > { %v4462_v33 = vadd.f32 %v4461_v35, %v4460_v20 }
 0x22b   : > { %v3630_v28 = vadd.f32 %v4462_v33, %v3589_v25 }
 0x237   : > { %v4479_v24 = vpop.f32.mrf.mxu0 }
 0x239   : > { %v4480_v48 = vpop.f32.mrf.mxu0 }
 0x23a   : > { %v4481_v8 = vadd.f32 %v4480_v48, %v4479_v24 }
 0x23b   : > { %v4482_v37 = vpop.f32.mrf.mxu0 }
 0x23c   : > { %v3668_v15 = vadd.f32 %v4481_v8, %v3627_v29 }
 0x23d   : > { %v4483_v63 = vpop.f32.mrf.mxu0 }
 0x23e   : > { %v4484_v50 = vadd.f32 %v4483_v63, %v4482_v37 }
 0x240   : > { %v3671_v0 = vadd.f32 %v4484_v50, %v3630_v28 }
 0x242   : > { %v4501_v57 = vpop.f32.mrf.mxu1 }
 0x244   : > { %v4502_v4 = vpop.f32.mrf.mxu1 }
 0x245   : > { %v4503_v60 = vadd.f32 %v4502_v4, %v4501_v57 }
 0x246   : > { %v4504_v6 = vpop.f32.mrf.mxu1 }
 0x247   : > { %v3709_v61 = vadd.f32 %v4503_v60, %v3668_v15 }
 0x248   : > { %v4505_v13 = vpop.f32.mrf.mxu1 }
 0x249   : > { %v4506_v42 = vadd.f32 %v4505_v13, %v4504_v6 }
 0x24b   : > { %v3712_v20 = vadd.f32 %v4506_v42, %v3671_v0 }
 0x257   : > { %v4523_v54 = vpop.f32.mrf.mxu0 }
 0x259   : > { %v4524_v16 = vpop.f32.mrf.mxu0 }
 0x25a   : > { %v4525_v17 = vadd.f32 %v4524_v16, %v4523_v54 }
 0x25b   : > { %v4526_v1 = vpop.f32.mrf.mxu0 }
 0x25c   : > { %v3750_v26 = vadd.f32 %v4525_v17, %v3709_v61 }
 0x25d   : > { %v4527_v36 = vpop.f32.mrf.mxu0 }
 0x25e   : > { %v4528_v24 = vadd.f32 %v4527_v36, %v4526_v1 }
 0x260   : > { %v3753_v31 = vadd.f32 %v4528_v24, %v3712_v20 }
 0x262   : > { %v4545_v53 = vpop.f32.mrf.mxu1 }
 0x264   : > { %v4546_v27 = vpop.f32.mrf.mxu1 }
 0x265   : > { %v4547_v7 = vadd.f32 %v4546_v27, %v4545_v53 }
 0x266   : > { %v4548_v55 = vpop.f32.mrf.mxu1 }
 0x267   : > { %v3791_v48 = vadd.f32 %v4547_v7, %v3750_v26 }
 0x268   : > { %v4549_v19 = vpop.f32.mrf.mxu1 }
 0x269   : > { %3797 = vst [vmem:[%s202_s22] sm:$0xff] %v3791_v48  ;;  %v4550_v21 = vadd.f32 %v4549_v19, %v4548_v55 }
 0x26b   : > { %v3794_v23 = vadd.f32 %v4550_v21, %v3753_v31 }
 0x26d   : > { %3798 = vst [vmem:[%s202_s22 + $0x8] sm:$0xff] %v3794_v23 }
 0x26e PF: > { %s14_s15 = sadd.s32 1, %s5022_s15  }
 0x26f   : > { %p11_p4 = scmp.ge.s32.totalorder %s14_s15, 4  }
 0x271   :  { %13 = sbr.rel (!%p11_p4) target bundleno = 1 (0x1), region = 66 }

</bundles_post_ra>
